<compile_context>
chip_gen: v7x
topology: tpu7x:2x2x1
jax: 0.10.0
libtpu: 0.0.40
codegen_flags: <defaults>
</compile_context>

<pallas_src>
import jax
import jax.numpy as jnp
from jax.experimental import pallas as pl
from jax.experimental.pallas import tpu as pltpu


# ----------------------------------------------------------------------------
# Fused kernel: all LSTM layers + final Linear, single program, all in VMEM.
# ----------------------------------------------------------------------------
def _make_sequence_kernel(num_layers, T, B, H):
    """Builds a kernel closed over the static dims.

    Ref order:
      inputs : x_flat (T*B, I), h0 (L,B,H), c0 (L,B,H),
               [w_ih_t, w_hh_t, b] * num_layers, w_out_t (H,O), b_out (1,O)
      outputs: out (B,O), h_n (L,B,H), c_n (L,B,H)
      scratch: y_sc (T*B, H)   -- per-step hidden states of the current layer
    """

    def kernel(*refs):
        x_ref, h0_ref, c0_ref = refs[0], refs[1], refs[2]
        w_refs = refs[3:3 + 3 * num_layers]
        w_out_ref = refs[3 + 3 * num_layers]
        b_out_ref = refs[4 + 3 * num_layers]
        out_ref = refs[5 + 3 * num_layers]
        hn_ref = refs[6 + 3 * num_layers]
        cn_ref = refs[7 + 3 * num_layers]
        y_sc = refs[8 + 3 * num_layers]

        # Lane mask selecting the `g` (cell candidate) gate block.  Built once
        # (hoisted: JAX does not CSE broadcast_in_dim inside loops).
        lane = jax.lax.broadcasted_iota(jnp.int32, (B, 4 * H), 1)
        g_mask = (lane >= 2 * H) & (lane < 3 * H)

        for l in range(num_layers):
            w_ih = w_refs[3 * l][...]        # (in_l, 4H)  pre-transposed
            w_hh = w_refs[3 * l + 1][...]    # (H, 4H)     pre-transposed
            b = w_refs[3 * l + 2][...]       # (1, 4H)     b_ih + b_hh

            # --- Hoisted input projection for all T steps at once ----------
            # layer 0 reads the (time-major, flattened) input; later layers
            # read the previous layer's hidden states straight out of VMEM.
            layer_in = x_ref[...] if l == 0 else y_sc[...]      # (T*B, in_l)
            gx = jnp.dot(layer_in, w_ih,
                         preferred_element_type=jnp.float32) + b  # (T*B, 4H)

            # --- Recurrence (serial) ---------------------------------------
            h = h0_ref[l]                    # (B, H)
            c = c0_ref[l]                    # (B, H)
            # T is small here, so the loop is fully unrolled at trace time.
            # TODO(synk): switch to lax.fori_loop(..., unroll=k) + pl.ds for
            # large T to bound code size / live ranges.
            for t in range(T):
                gates = gx[t * B:(t + 1) * B, :] + jnp.dot(
                    h, w_hh, preferred_element_type=jnp.float32)   # (B, 4H)
                # Full-width activations (2 EUP passes), select g vs sigmoid.
                act = jnp.where(g_mask, jnp.tanh(gates),
                                jax.nn.sigmoid(gates))
                i_g = act[:, 0 * H:1 * H]
                f_g = act[:, 1 * H:2 * H]
                g_g = act[:, 2 * H:3 * H]
                o_g = act[:, 3 * H:4 * H]
                c = f_g * c + i_g * g_g
                h = o_g * jnp.tanh(c)
                y_sc[t * B:(t + 1) * B, :] = h

            hn_ref[l] = h
            cn_ref[l] = c

        # --- Final linear head, fused: out = output[:, -1, :] @ W_out^T + b --
        last = y_sc[(T - 1) * B:T * B, :]                    # (B, H)
        out_ref[...] = (jnp.dot(last, w_out_ref[...],
                                preferred_element_type=jnp.float32)
                        + b_out_ref[...])

    return kernel


# ----------------------------------------------------------------------------
# Sequence.forward
# ----------------------------------------------------------------------------
def sequence_forward(params, x, h_0, c_0):
    """x: (B, T, input_size) batch_first; h_0/c_0: (num_layers, B, H)."""
    B, T, I = x.shape
    L, _, H = h_0.shape
    O = params["w_out_t"].shape[1]

    # One-time, tiny, time-major flatten outside the kernel so layer 0's
    # hoisted projection is a clean 2D (T*B, I) matmul. Row index = t*B + b.
    x_flat = jnp.transpose(x, (1, 0, 2)).reshape(T * B, I)

    inputs = [x_flat, h_0, c_0]
    for p in params["lstm"]:
        inputs += [p["w_ih_t"], p["w_hh_t"], p["b"]]
    inputs += [params["w_out_t"], params["b_out"].reshape(1, O)]

    kernel = _make_sequence_kernel(L, T, B, H)

    out, h_n, c_n = pl.pallas_call(
        kernel,
        out_shape=(jax.ShapeDtypeStruct((B, O), jnp.float32),
                   jax.ShapeDtypeStruct((L, B, H), jnp.float32),
                   jax.ShapeDtypeStruct((L, B, H), jnp.float32)),
        scratch_shapes=[pltpu.VMEM((T * B, H), jnp.float32)],
    )(*inputs)
    return out, h_n, c_n


# ----------------------------------------------------------------------------
# Pure-JAX reference (for correctness check)
# ----------------------------------------------------------------------------
def sequence_reference(params, x, h_0, c_0):
    B, T, _ = x.shape
    H = h_0.shape[-1]
    layer_in = x
    h_out, c_out = [], []
    for l, p in enumerate(params["lstm"]):
        h, c = h_0[l], c_0[l]
        ys = []
        for t in range(T):
            gates = (layer_in[:, t, :] @ p["w_ih_t"] + h @ p["w_hh_t"]
                     + p["b"][0])
            i = jax.nn.sigmoid(gates[:, 0 * H:1 * H])
            f = jax.nn.sigmoid(gates[:, 1 * H:2 * H])
            g = jnp.tanh(gates[:, 2 * H:3 * H])
            o = jax.nn.sigmoid(gates[:, 3 * H:4 * H])
            c = f * c + i * g
            h = o * jnp.tanh(c)
            ys.append(h)
        layer_in = jnp.stack(ys, axis=1)
        h_out.append(h)
        c_out.append(c)
    out = layer_in[:, -1, :] @ params["w_out_t"] + params["b_out"]
    return out, jnp.stack(h_out), jnp.stack(c_out)


# ----------------------------------------------------------------------------
# Deterministic parameter init (PyTorch-style uniform(-1/sqrt(H), 1/sqrt(H))),
# stored pre-transposed for the kernel (no in-kernel .T).
# ----------------------------------------------------------------------------
def init_params(key, input_size, num_layers, hidden_size, out_size):
    k = 1.0 / jnp.sqrt(hidden_size)
    params = {"lstm": []}
    for l in range(num_layers):
        in_l = input_size if l == 0 else hidden_size
        key, k1, k2, k3, k4 = jax.random.split(key, 5)
        w_ih = jax.random.uniform(k1, (4 * hidden_size, in_l),
                                  jnp.float32, -k, k)
        w_hh = jax.random.uniform(k2, (4 * hidden_size, hidden_size),
                                  jnp.float32, -k, k)
        b_ih = jax.random.uniform(k3, (4 * hidden_size,), jnp.float32, -k, k)
        b_hh = jax.random.uniform(k4, (4 * hidden_size,), jnp.float32, -k, k)
        params["lstm"].append({
            "w_ih_t": w_ih.T,                                  # (in_l, 4H)
            "w_hh_t": w_hh.T,                                  # (H, 4H)
            "b": (b_ih + b_hh).reshape(1, 4 * hidden_size),    # (1, 4H)
        })
    key, k1, k2 = jax.random.split(key, 3)
    w_out = jax.random.uniform(k1, (out_size, hidden_size), jnp.float32, -k, k)
    b_out = jax.random.uniform(k2, (out_size,), jnp.float32, -k, k)
    params["w_out_t"] = w_out.T                                # (H, O)
    params["b_out"] = b_out                                    # (O,)
    return params


if __name__ == "__main__":
    # Small shapes consistent with Sequence(input_size, num_layers, hidden, out)
    batch, seq = 2, 8
    input_size, num_layers, hidden_size, out_size = 16, 2, 32, 4

    key = jax.random.PRNGKey(0)
    key, kp, kx, kh, kc = jax.random.split(key, 5)

    params = init_params(kp, input_size, num_layers, hidden_size, out_size)
    x = jax.random.normal(kx, (batch, seq, input_size), jnp.float32)
    h_0 = jax.random.normal(kh, (num_layers, batch, hidden_size),
                            jnp.float32) * 0.1
    c_0 = jax.random.normal(kc, (num_layers, batch, hidden_size),
                            jnp.float32) * 0.1

    out, h_n, c_n = sequence_forward(params, x, h_0, c_0)
    jax.block_until_ready((out, h_n, c_n))

    # Correctness check against pure-JAX reference.
    out_r, h_r, c_r = sequence_reference(params, x, h_0, c_0)
    assert jnp.allclose(out, out_r, atol=1e-4), "linear output mismatch"
    assert jnp.allclose(h_n, h_r, atol=1e-4), "h_n mismatch"
    assert jnp.allclose(c_n, c_r, atol=1e-4), "c_n mismatch"

    print("KERNEL_OK")
</pallas_src>

<mosaic_0001>
module attributes {stable_mosaic.version = 11 : i64} {
  func.func @kernel(%arg0: memref<16x16xf32, #tpu.memory_space<vmem>>, %arg1: memref<2x2x32xf32, #tpu.memory_space<vmem>>, %arg2: memref<2x2x32xf32, #tpu.memory_space<vmem>>, %arg3: memref<16x128xf32, #tpu.memory_space<vmem>>, %arg4: memref<32x128xf32, #tpu.memory_space<vmem>>, %arg5: memref<1x128xf32, #tpu.memory_space<vmem>>, %arg6: memref<32x128xf32, #tpu.memory_space<vmem>>, %arg7: memref<32x128xf32, #tpu.memory_space<vmem>>, %arg8: memref<1x128xf32, #tpu.memory_space<vmem>>, %arg9: memref<32x4xf32, #tpu.memory_space<vmem>>, %arg10: memref<1x4xf32, #tpu.memory_space<vmem>>, %arg11: memref<2x4xf32, #tpu.memory_space<vmem>>, %arg12: memref<2x2x32xf32, #tpu.memory_space<vmem>>, %arg13: memref<2x2x32xf32, #tpu.memory_space<vmem>>, %arg14: memref<16x32xf32, #tpu.memory_space<vmem>>) attributes {dimension_semantics = [], scalar_prefetch = 0 : i64, scratch_operands = 1 : i64, tpu.core_type = #tpu.core_type<tc>} {
    %0 = tpu.iota {dimensions = array<i32: 1>} : vector<2x128xi32>
    %c64_i32 = arith.constant 64 : i32
    %1 = vector.broadcast %c64_i32 : i32 to vector<2x128xi32>
    %2 = arith.cmpi sge, %0, %1 : vector<2x128xi32>
    %c96_i32 = arith.constant 96 : i32
    %3 = vector.broadcast %c96_i32 : i32 to vector<2x128xi32>
    %4 = arith.cmpi slt, %0, %3 : vector<2x128xi32>
    %5 = arith.andi %2, %4 : vector<2x128xi1>
    %c0 = arith.constant 0 : index
    %c0_0 = arith.constant 0 : index
    %6 = vector.load %arg3[%c0, %c0_0] : memref<16x128xf32, #tpu.memory_space<vmem>>, vector<16x128xf32>
    %c0_1 = arith.constant 0 : index
    %c0_2 = arith.constant 0 : index
    %7 = vector.load %arg4[%c0_1, %c0_2] : memref<32x128xf32, #tpu.memory_space<vmem>>, vector<32x128xf32>
    %c0_3 = arith.constant 0 : index
    %c0_4 = arith.constant 0 : index
    %8 = vector.load %arg5[%c0_3, %c0_4] : memref<1x128xf32, #tpu.memory_space<vmem>>, vector<1x128xf32>
    %c0_5 = arith.constant 0 : index
    %c0_6 = arith.constant 0 : index
    %9 = vector.load %arg0[%c0_5, %c0_6] : memref<16x16xf32, #tpu.memory_space<vmem>>, vector<16x16xf32>
    %cst = arith.constant dense<0.000000e+00> : vector<16x128xf32>
    %10 = tpu.matmul %9, %6, %cst {dimension_numbers = #tpu.dot_dimension_numbers<[1], [0], [0], [1], [0, 0, 1, 1], [], []>} : vector<16x16xf32>, vector<16x128xf32>, vector<16x128xf32> -> vector<16x128xf32>
    %11 = vector.broadcast %8 : vector<1x128xf32> to vector<16x128xf32>
    %12 = arith.addf %10, %11 : vector<16x128xf32>
    %c0_7 = arith.constant 0 : index
    %c0_8 = arith.constant 0 : index
    %c0_9 = arith.constant 0 : index
    %13 = vector.load %arg1[%c0_7, %c0_8, %c0_9] : memref<2x2x32xf32, #tpu.memory_space<vmem>>, vector<1x2x32xf32>
    %14 = vector.shape_cast %13 : vector<1x2x32xf32> to vector<2x32xf32>
    %c0_10 = arith.constant 0 : index
    %c0_11 = arith.constant 0 : index
    %c0_12 = arith.constant 0 : index
    %15 = vector.load %arg2[%c0_10, %c0_11, %c0_12] : memref<2x2x32xf32, #tpu.memory_space<vmem>>, vector<1x2x32xf32>
    %16 = vector.shape_cast %15 : vector<1x2x32xf32> to vector<2x32xf32>
    %17 = vector.extract_strided_slice %12 {offsets = [0, 0], sizes = [2, 128], strides = [1, 1]} : vector<16x128xf32> to vector<2x128xf32>
    %cst_13 = arith.constant dense<0.000000e+00> : vector<2x128xf32>
    %18 = tpu.matmul %14, %7, %cst_13 {dimension_numbers = #tpu.dot_dimension_numbers<[1], [0], [0], [1], [0, 0, 1, 1], [], []>} : vector<2x32xf32>, vector<32x128xf32>, vector<2x128xf32> -> vector<2x128xf32>
    %19 = arith.addf %17, %18 : vector<2x128xf32>
    %20 = math.tanh %19 : vector<2x128xf32>
    %21 = arith.negf %19 : vector<2x128xf32>
    %22 = math.exp %21 : vector<2x128xf32>
    %cst_14 = arith.constant 1.000000e+00 : f32
    %23 = vector.broadcast %cst_14 : f32 to vector<2x128xf32>
    %24 = arith.addf %23, %22 : vector<2x128xf32>
    %25 = arith.divf %23, %24 : vector<2x128xf32>
    %26 = arith.select %5, %20, %25 : vector<2x128xi1>, vector<2x128xf32>
    %27 = vector.extract_strided_slice %26 {offsets = [0, 0], sizes = [2, 32], strides = [1, 1]} : vector<2x128xf32> to vector<2x32xf32>
    %28 = vector.extract_strided_slice %26 {offsets = [0, 32], sizes = [2, 32], strides = [1, 1]} : vector<2x128xf32> to vector<2x32xf32>
    %29 = vector.extract_strided_slice %26 {offsets = [0, 64], sizes = [2, 32], strides = [1, 1]} : vector<2x128xf32> to vector<2x32xf32>
    %30 = vector.extract_strided_slice %26 {offsets = [0, 96], sizes = [2, 32], strides = [1, 1]} : vector<2x128xf32> to vector<2x32xf32>
    %31 = arith.mulf %28, %16 : vector<2x32xf32>
    %32 = arith.mulf %27, %29 : vector<2x32xf32>
    %33 = arith.addf %31, %32 : vector<2x32xf32>
    %34 = math.tanh %33 : vector<2x32xf32>
    %35 = arith.mulf %30, %34 : vector<2x32xf32>
    %c0_15 = arith.constant 0 : index
    %c0_16 = arith.constant 0 : index
    %36 = vector.load %arg14[%c0_15, %c0_16] : memref<16x32xf32, #tpu.memory_space<vmem>>, vector<2x32xf32>
    tpu.vector_store %arg14[%c0_15, %c0_16], %35 {strides = array<i32>} : memref<16x32xf32, #tpu.memory_space<vmem>>, vector<2x32xf32>,
    %37 = vector.extract_strided_slice %12 {offsets = [2, 0], sizes = [2, 128], strides = [1, 1]} : vector<16x128xf32> to vector<2x128xf32>
    %cst_17 = arith.constant dense<0.000000e+00> : vector<2x128xf32>
    %38 = tpu.matmul %35, %7, %cst_17 {dimension_numbers = #tpu.dot_dimension_numbers<[1], [0], [0], [1], [0, 0, 1, 1], [], []>} : vector<2x32xf32>, vector<32x128xf32>, vector<2x128xf32> -> vector<2x128xf32>
    %39 = arith.addf %37, %38 : vector<2x128xf32>
    %40 = math.tanh %39 : vector<2x128xf32>
    %41 = arith.negf %39 : vector<2x128xf32>
    %42 = math.exp %41 : vector<2x128xf32>
    %cst_18 = arith.constant 1.000000e+00 : f32
    %43 = vector.broadcast %cst_18 : f32 to vector<2x128xf32>
    %44 = arith.addf %43, %42 : vector<2x128xf32>
    %45 = arith.divf %43, %44 : vector<2x128xf32>
    %46 = arith.select %5, %40, %45 : vector<2x128xi1>, vector<2x128xf32>
    %47 = vector.extract_strided_slice %46 {offsets = [0, 0], sizes = [2, 32], strides = [1, 1]} : vector<2x128xf32> to vector<2x32xf32>
    %48 = vector.extract_strided_slice %46 {offsets = [0, 32], sizes = [2, 32], strides = [1, 1]} : vector<2x128xf32> to vector<2x32xf32>
    %49 = vector.extract_strided_slice %46 {offsets = [0, 64], sizes = [2, 32], strides = [1, 1]} : vector<2x128xf32> to vector<2x32xf32>
    %50 = vector.extract_strided_slice %46 {offsets = [0, 96], sizes = [2, 32], strides = [1, 1]} : vector<2x128xf32> to vector<2x32xf32>
    %51 = arith.mulf %48, %33 : vector<2x32xf32>
    %52 = arith.mulf %47, %49 : vector<2x32xf32>
    %53 = arith.addf %51, %52 : vector<2x32xf32>
    %54 = math.tanh %53 : vector<2x32xf32>
    %55 = arith.mulf %50, %54 : vector<2x32xf32>
    %c2 = arith.constant 2 : index
    %c0_19 = arith.constant 0 : index
    %56 = vector.load %arg14[%c2, %c0_19] : memref<16x32xf32, #tpu.memory_space<vmem>>, vector<2x32xf32>
    tpu.vector_store %arg14[%c2, %c0_19], %55 {strides = array<i32>} : memref<16x32xf32, #tpu.memory_space<vmem>>, vector<2x32xf32>,
    %57 = vector.extract_strided_slice %12 {offsets = [4, 0], sizes = [2, 128], strides = [1, 1]} : vector<16x128xf32> to vector<2x128xf32>
    %cst_20 = arith.constant dense<0.000000e+00> : vector<2x128xf32>
    %58 = tpu.matmul %55, %7, %cst_20 {dimension_numbers = #tpu.dot_dimension_numbers<[1], [0], [0], [1], [0, 0, 1, 1], [], []>} : vector<2x32xf32>, vector<32x128xf32>, vector<2x128xf32> -> vector<2x128xf32>
    %59 = arith.addf %57, %58 : vector<2x128xf32>
    %60 = math.tanh %59 : vector<2x128xf32>
    %61 = arith.negf %59 : vector<2x128xf32>
    %62 = math.exp %61 : vector<2x128xf32>
    %cst_21 = arith.constant 1.000000e+00 : f32
    %63 = vector.broadcast %cst_21 : f32 to vector<2x128xf32>
    %64 = arith.addf %63, %62 : vector<2x128xf32>
    %65 = arith.divf %63, %64 : vector<2x128xf32>
    %66 = arith.select %5, %60, %65 : vector<2x128xi1>, vector<2x128xf32>
    %67 = vector.extract_strided_slice %66 {offsets = [0, 0], sizes = [2, 32], strides = [1, 1]} : vector<2x128xf32> to vector<2x32xf32>
    %68 = vector.extract_strided_slice %66 {offsets = [0, 32], sizes = [2, 32], strides = [1, 1]} : vector<2x128xf32> to vector<2x32xf32>
    %69 = vector.extract_strided_slice %66 {offsets = [0, 64], sizes = [2, 32], strides = [1, 1]} : vector<2x128xf32> to vector<2x32xf32>
    %70 = vector.extract_strided_slice %66 {offsets = [0, 96], sizes = [2, 32], strides = [1, 1]} : vector<2x128xf32> to vector<2x32xf32>
    %71 = arith.mulf %68, %53 : vector<2x32xf32>
    %72 = arith.mulf %67, %69 : vector<2x32xf32>
    %73 = arith.addf %71, %72 : vector<2x32xf32>
    %74 = math.tanh %73 : vector<2x32xf32>
    %75 = arith.mulf %70, %74 : vector<2x32xf32>
    %c4 = arith.constant 4 : index
    %c0_22 = arith.constant 0 : index
    %76 = vector.load %arg14[%c4, %c0_22] : memref<16x32xf32, #tpu.memory_space<vmem>>, vector<2x32xf32>
    tpu.vector_store %arg14[%c4, %c0_22], %75 {strides = array<i32>} : memref<16x32xf32, #tpu.memory_space<vmem>>, vector<2x32xf32>,
    %77 = vector.extract_strided_slice %12 {offsets = [6, 0], sizes = [2, 128], strides = [1, 1]} : vector<16x128xf32> to vector<2x128xf32>
    %cst_23 = arith.constant dense<0.000000e+00> : vector<2x128xf32>
    %78 = tpu.matmul %75, %7, %cst_23 {dimension_numbers = #tpu.dot_dimension_numbers<[1], [0], [0], [1], [0, 0, 1, 1], [], []>} : vector<2x32xf32>, vector<32x128xf32>, vector<2x128xf32> -> vector<2x128xf32>
    %79 = arith.addf %77, %78 : vector<2x128xf32>
    %80 = math.tanh %79 : vector<2x128xf32>
    %81 = arith.negf %79 : vector<2x128xf32>
    %82 = math.exp %81 : vector<2x128xf32>
    %cst_24 = arith.constant 1.000000e+00 : f32
    %83 = vector.broadcast %cst_24 : f32 to vector<2x128xf32>
    %84 = arith.addf %83, %82 : vector<2x128xf32>
    %85 = arith.divf %83, %84 : vector<2x128xf32>
    %86 = arith.select %5, %80, %85 : vector<2x128xi1>, vector<2x128xf32>
    %87 = vector.extract_strided_slice %86 {offsets = [0, 0], sizes = [2, 32], strides = [1, 1]} : vector<2x128xf32> to vector<2x32xf32>
    %88 = vector.extract_strided_slice %86 {offsets = [0, 32], sizes = [2, 32], strides = [1, 1]} : vector<2x128xf32> to vector<2x32xf32>
    %89 = vector.extract_strided_slice %86 {offsets = [0, 64], sizes = [2, 32], strides = [1, 1]} : vector<2x128xf32> to vector<2x32xf32>
    %90 = vector.extract_strided_slice %86 {offsets = [0, 96], sizes = [2, 32], strides = [1, 1]} : vector<2x128xf32> to vector<2x32xf32>
    %91 = arith.mulf %88, %73 : vector<2x32xf32>
    %92 = arith.mulf %87, %89 : vector<2x32xf32>
    %93 = arith.addf %91, %92 : vector<2x32xf32>
    %94 = math.tanh %93 : vector<2x32xf32>
    %95 = arith.mulf %90, %94 : vector<2x32xf32>
    %c6 = arith.constant 6 : index
    %c0_25 = arith.constant 0 : index
    %96 = vector.load %arg14[%c6, %c0_25] : memref<16x32xf32, #tpu.memory_space<vmem>>, vector<2x32xf32>
    tpu.vector_store %arg14[%c6, %c0_25], %95 {strides = array<i32>} : memref<16x32xf32, #tpu.memory_space<vmem>>, vector<2x32xf32>,
    %97 = vector.extract_strided_slice %12 {offsets = [8, 0], sizes = [2, 128], strides = [1, 1]} : vector<16x128xf32> to vector<2x128xf32>
    %cst_26 = arith.constant dense<0.000000e+00> : vector<2x128xf32>
    %98 = tpu.matmul %95, %7, %cst_26 {dimension_numbers = #tpu.dot_dimension_numbers<[1], [0], [0], [1], [0, 0, 1, 1], [], []>} : vector<2x32xf32>, vector<32x128xf32>, vector<2x128xf32> -> vector<2x128xf32>
    %99 = arith.addf %97, %98 : vector<2x128xf32>
    %100 = math.tanh %99 : vector<2x128xf32>
    %101 = arith.negf %99 : vector<2x128xf32>
    %102 = math.exp %101 : vector<2x128xf32>
    %cst_27 = arith.constant 1.000000e+00 : f32
    %103 = vector.broadcast %cst_27 : f32 to vector<2x128xf32>
    %104 = arith.addf %103, %102 : vector<2x128xf32>
    %105 = arith.divf %103, %104 : vector<2x128xf32>
    %106 = arith.select %5, %100, %105 : vector<2x128xi1>, vector<2x128xf32>
    %107 = vector.extract_strided_slice %106 {offsets = [0, 0], sizes = [2, 32], strides = [1, 1]} : vector<2x128xf32> to vector<2x32xf32>
    %108 = vector.extract_strided_slice %106 {offsets = [0, 32], sizes = [2, 32], strides = [1, 1]} : vector<2x128xf32> to vector<2x32xf32>
    %109 = vector.extract_strided_slice %106 {offsets = [0, 64], sizes = [2, 32], strides = [1, 1]} : vector<2x128xf32> to vector<2x32xf32>
    %110 = vector.extract_strided_slice %106 {offsets = [0, 96], sizes = [2, 32], strides = [1, 1]} : vector<2x128xf32> to vector<2x32xf32>
    %111 = arith.mulf %108, %93 : vector<2x32xf32>
    %112 = arith.mulf %107, %109 : vector<2x32xf32>
    %113 = arith.addf %111, %112 : vector<2x32xf32>
    %114 = math.tanh %113 : vector<2x32xf32>
    %115 = arith.mulf %110, %114 : vector<2x32xf32>
    %c8 = arith.constant 8 : index
    %c0_28 = arith.constant 0 : index
    %116 = vector.load %arg14[%c8, %c0_28] : memref<16x32xf32, #tpu.memory_space<vmem>>, vector<2x32xf32>
    tpu.vector_store %arg14[%c8, %c0_28], %115 {strides = array<i32>} : memref<16x32xf32, #tpu.memory_space<vmem>>, vector<2x32xf32>,
    %117 = vector.extract_strided_slice %12 {offsets = [10, 0], sizes = [2, 128], strides = [1, 1]} : vector<16x128xf32> to vector<2x128xf32>
    %cst_29 = arith.constant dense<0.000000e+00> : vector<2x128xf32>
    %118 = tpu.matmul %115, %7, %cst_29 {dimension_numbers = #tpu.dot_dimension_numbers<[1], [0], [0], [1], [0, 0, 1, 1], [], []>} : vector<2x32xf32>, vector<32x128xf32>, vector<2x128xf32> -> vector<2x128xf32>
    %119 = arith.addf %117, %118 : vector<2x128xf32>
    %120 = math.tanh %119 : vector<2x128xf32>
    %121 = arith.negf %119 : vector<2x128xf32>
    %122 = math.exp %121 : vector<2x128xf32>
    %cst_30 = arith.constant 1.000000e+00 : f32
    %123 = vector.broadcast %cst_30 : f32 to vector<2x128xf32>
    %124 = arith.addf %123, %122 : vector<2x128xf32>
    %125 = arith.divf %123, %124 : vector<2x128xf32>
    %126 = arith.select %5, %120, %125 : vector<2x128xi1>, vector<2x128xf32>
    %127 = vector.extract_strided_slice %126 {offsets = [0, 0], sizes = [2, 32], strides = [1, 1]} : vector<2x128xf32> to vector<2x32xf32>
    %128 = vector.extract_strided_slice %126 {offsets = [0, 32], sizes = [2, 32], strides = [1, 1]} : vector<2x128xf32> to vector<2x32xf32>
    %129 = vector.extract_strided_slice %126 {offsets = [0, 64], sizes = [2, 32], strides = [1, 1]} : vector<2x128xf32> to vector<2x32xf32>
    %130 = vector.extract_strided_slice %126 {offsets = [0, 96], sizes = [2, 32], strides = [1, 1]} : vector<2x128xf32> to vector<2x32xf32>
    %131 = arith.mulf %128, %113 : vector<2x32xf32>
    %132 = arith.mulf %127, %129 : vector<2x32xf32>
    %133 = arith.addf %131, %132 : vector<2x32xf32>
    %134 = math.tanh %133 : vector<2x32xf32>
    %135 = arith.mulf %130, %134 : vector<2x32xf32>
    %c10 = arith.constant 10 : index
    %c0_31 = arith.constant 0 : index
    %136 = vector.load %arg14[%c10, %c0_31] : memref<16x32xf32, #tpu.memory_space<vmem>>, vector<2x32xf32>
    tpu.vector_store %arg14[%c10, %c0_31], %135 {strides = array<i32>} : memref<16x32xf32, #tpu.memory_space<vmem>>, vector<2x32xf32>,
    %137 = vector.extract_strided_slice %12 {offsets = [12, 0], sizes = [2, 128], strides = [1, 1]} : vector<16x128xf32> to vector<2x128xf32>
    %cst_32 = arith.constant dense<0.000000e+00> : vector<2x128xf32>
    %138 = tpu.matmul %135, %7, %cst_32 {dimension_numbers = #tpu.dot_dimension_numbers<[1], [0], [0], [1], [0, 0, 1, 1], [], []>} : vector<2x32xf32>, vector<32x128xf32>, vector<2x128xf32> -> vector<2x128xf32>
    %139 = arith.addf %137, %138 : vector<2x128xf32>
    %140 = math.tanh %139 : vector<2x128xf32>
    %141 = arith.negf %139 : vector<2x128xf32>
    %142 = math.exp %141 : vector<2x128xf32>
    %cst_33 = arith.constant 1.000000e+00 : f32
    %143 = vector.broadcast %cst_33 : f32 to vector<2x128xf32>
    %144 = arith.addf %143, %142 : vector<2x128xf32>
    %145 = arith.divf %143, %144 : vector<2x128xf32>
    %146 = arith.select %5, %140, %145 : vector<2x128xi1>, vector<2x128xf32>
    %147 = vector.extract_strided_slice %146 {offsets = [0, 0], sizes = [2, 32], strides = [1, 1]} : vector<2x128xf32> to vector<2x32xf32>
    %148 = vector.extract_strided_slice %146 {offsets = [0, 32], sizes = [2, 32], strides = [1, 1]} : vector<2x128xf32> to vector<2x32xf32>
    %149 = vector.extract_strided_slice %146 {offsets = [0, 64], sizes = [2, 32], strides = [1, 1]} : vector<2x128xf32> to vector<2x32xf32>
    %150 = vector.extract_strided_slice %146 {offsets = [0, 96], sizes = [2, 32], strides = [1, 1]} : vector<2x128xf32> to vector<2x32xf32>
    %151 = arith.mulf %148, %133 : vector<2x32xf32>
    %152 = arith.mulf %147, %149 : vector<2x32xf32>
    %153 = arith.addf %151, %152 : vector<2x32xf32>
    %154 = math.tanh %153 : vector<2x32xf32>
    %155 = arith.mulf %150, %154 : vector<2x32xf32>
    %c12 = arith.constant 12 : index
    %c0_34 = arith.constant 0 : index
    %156 = vector.load %arg14[%c12, %c0_34] : memref<16x32xf32, #tpu.memory_space<vmem>>, vector<2x32xf32>
    tpu.vector_store %arg14[%c12, %c0_34], %155 {strides = array<i32>} : memref<16x32xf32, #tpu.memory_space<vmem>>, vector<2x32xf32>,
    %157 = vector.extract_strided_slice %12 {offsets = [14, 0], sizes = [2, 128], strides = [1, 1]} : vector<16x128xf32> to vector<2x128xf32>
    %cst_35 = arith.constant dense<0.000000e+00> : vector<2x128xf32>
    %158 = tpu.matmul %155, %7, %cst_35 {dimension_numbers = #tpu.dot_dimension_numbers<[1], [0], [0], [1], [0, 0, 1, 1], [], []>} : vector<2x32xf32>, vector<32x128xf32>, vector<2x128xf32> -> vector<2x128xf32>
    %159 = arith.addf %157, %158 : vector<2x128xf32>
    %160 = math.tanh %159 : vector<2x128xf32>
    %161 = arith.negf %159 : vector<2x128xf32>
    %162 = math.exp %161 : vector<2x128xf32>
    %cst_36 = arith.constant 1.000000e+00 : f32
    %163 = vector.broadcast %cst_36 : f32 to vector<2x128xf32>
    %164 = arith.addf %163, %162 : vector<2x128xf32>
    %165 = arith.divf %163, %164 : vector<2x128xf32>
    %166 = arith.select %5, %160, %165 : vector<2x128xi1>, vector<2x128xf32>
    %167 = vector.extract_strided_slice %166 {offsets = [0, 0], sizes = [2, 32], strides = [1, 1]} : vector<2x128xf32> to vector<2x32xf32>
    %168 = vector.extract_strided_slice %166 {offsets = [0, 32], sizes = [2, 32], strides = [1, 1]} : vector<2x128xf32> to vector<2x32xf32>
    %169 = vector.extract_strided_slice %166 {offsets = [0, 64], sizes = [2, 32], strides = [1, 1]} : vector<2x128xf32> to vector<2x32xf32>
    %170 = vector.extract_strided_slice %166 {offsets = [0, 96], sizes = [2, 32], strides = [1, 1]} : vector<2x128xf32> to vector<2x32xf32>
    %171 = arith.mulf %168, %153 : vector<2x32xf32>
    %172 = arith.mulf %167, %169 : vector<2x32xf32>
    %173 = arith.addf %171, %172 : vector<2x32xf32>
    %174 = math.tanh %173 : vector<2x32xf32>
    %175 = arith.mulf %170, %174 : vector<2x32xf32>
    %c14 = arith.constant 14 : index
    %c0_37 = arith.constant 0 : index
    %176 = vector.load %arg14[%c14, %c0_37] : memref<16x32xf32, #tpu.memory_space<vmem>>, vector<2x32xf32>
    tpu.vector_store %arg14[%c14, %c0_37], %175 {strides = array<i32>} : memref<16x32xf32, #tpu.memory_space<vmem>>, vector<2x32xf32>,
    %c0_38 = arith.constant 0 : index
    %c0_39 = arith.constant 0 : index
    %c0_40 = arith.constant 0 : index
    %177 = vector.load %arg12[%c0_38, %c0_39, %c0_40] : memref<2x2x32xf32, #tpu.memory_space<vmem>>, vector<1x2x32xf32>
    %178 = vector.shape_cast %177 : vector<1x2x32xf32> to vector<2x32xf32>
    %179 = vector.shape_cast %175 : vector<2x32xf32> to vector<1x2x32xf32>
    tpu.vector_store %arg12[%c0_38, %c0_39, %c0_40], %179 {strides = array<i32>} : memref<2x2x32xf32, #tpu.memory_space<vmem>>, vector<1x2x32xf32>,
    %c0_41 = arith.constant 0 : index
    %c0_42 = arith.constant 0 : index
    %c0_43 = arith.constant 0 : index
    %180 = vector.load %arg13[%c0_41, %c0_42, %c0_43] : memref<2x2x32xf32, #tpu.memory_space<vmem>>, vector<1x2x32xf32>
    %181 = vector.shape_cast %180 : vector<1x2x32xf32> to vector<2x32xf32>
    %182 = vector.shape_cast %173 : vector<2x32xf32> to vector<1x2x32xf32>
    tpu.vector_store %arg13[%c0_41, %c0_42, %c0_43], %182 {strides = array<i32>} : memref<2x2x32xf32, #tpu.memory_space<vmem>>, vector<1x2x32xf32>,
    %c0_44 = arith.constant 0 : index
    %c0_45 = arith.constant 0 : index
    %183 = vector.load %arg6[%c0_44, %c0_45] : memref<32x128xf32, #tpu.memory_space<vmem>>, vector<32x128xf32>
    %c0_46 = arith.constant 0 : index
    %c0_47 = arith.constant 0 : index
    %184 = vector.load %arg7[%c0_46, %c0_47] : memref<32x128xf32, #tpu.memory_space<vmem>>, vector<32x128xf32>
    %c0_48 = arith.constant 0 : index
    %c0_49 = arith.constant 0 : index
    %185 = vector.load %arg8[%c0_48, %c0_49] : memref<1x128xf32, #tpu.memory_space<vmem>>, vector<1x128xf32>
    %c0_50 = arith.constant 0 : index
    %c0_51 = arith.constant 0 : index
    %186 = vector.load %arg14[%c0_50, %c0_51] : memref<16x32xf32, #tpu.memory_space<vmem>>, vector<16x32xf32>
    %cst_52 = arith.constant dense<0.000000e+00> : vector<16x128xf32>
    %187 = tpu.matmul %186, %183, %cst_52 {dimension_numbers = #tpu.dot_dimension_numbers<[1], [0], [0], [1], [0, 0, 1, 1], [], []>} : vector<16x32xf32>, vector<32x128xf32>, vector<16x128xf32> -> vector<16x128xf32>
    %188 = vector.broadcast %185 : vector<1x128xf32> to vector<16x128xf32>
    %189 = arith.addf %187, %188 : vector<16x128xf32>
    %c1 = arith.constant 1 : index
    %c0_53 = arith.constant 0 : index
    %c0_54 = arith.constant 0 : index
    %190 = vector.load %arg1[%c1, %c0_53, %c0_54] : memref<2x2x32xf32, #tpu.memory_space<vmem>>, vector<1x2x32xf32>
    %191 = vector.shape_cast %190 : vector<1x2x32xf32> to vector<2x32xf32>
    %c1_55 = arith.constant 1 : index
    %c0_56 = arith.constant 0 : index
    %c0_57 = arith.constant 0 : index
    %192 = vector.load %arg2[%c1_55, %c0_56, %c0_57] : memref<2x2x32xf32, #tpu.memory_space<vmem>>, vector<1x2x32xf32>
    %193 = vector.shape_cast %192 : vector<1x2x32xf32> to vector<2x32xf32>
    %194 = vector.extract_strided_slice %189 {offsets = [0, 0], sizes = [2, 128], strides = [1, 1]} : vector<16x128xf32> to vector<2x128xf32>
    %cst_58 = arith.constant dense<0.000000e+00> : vector<2x128xf32>
    %195 = tpu.matmul %191, %184, %cst_58 {dimension_numbers = #tpu.dot_dimension_numbers<[1], [0], [0], [1], [0, 0, 1, 1], [], []>} : vector<2x32xf32>, vector<32x128xf32>, vector<2x128xf32> -> vector<2x128xf32>
    %196 = arith.addf %194, %195 : vector<2x128xf32>
    %197 = math.tanh %196 : vector<2x128xf32>
    %198 = arith.negf %196 : vector<2x128xf32>
    %199 = math.exp %198 : vector<2x128xf32>
    %cst_59 = arith.constant 1.000000e+00 : f32
    %200 = vector.broadcast %cst_59 : f32 to vector<2x128xf32>
    %201 = arith.addf %200, %199 : vector<2x128xf32>
    %202 = arith.divf %200, %201 : vector<2x128xf32>
    %203 = arith.select %5, %197, %202 : vector<2x128xi1>, vector<2x128xf32>
    %204 = vector.extract_strided_slice %203 {offsets = [0, 0], sizes = [2, 32], strides = [1, 1]} : vector<2x128xf32> to vector<2x32xf32>
    %205 = vector.extract_strided_slice %203 {offsets = [0, 32], sizes = [2, 32], strides = [1, 1]} : vector<2x128xf32> to vector<2x32xf32>
    %206 = vector.extract_strided_slice %203 {offsets = [0, 64], sizes = [2, 32], strides = [1, 1]} : vector<2x128xf32> to vector<2x32xf32>
    %207 = vector.extract_strided_slice %203 {offsets = [0, 96], sizes = [2, 32], strides = [1, 1]} : vector<2x128xf32> to vector<2x32xf32>
    %208 = arith.mulf %205, %193 : vector<2x32xf32>
    %209 = arith.mulf %204, %206 : vector<2x32xf32>
    %210 = arith.addf %208, %209 : vector<2x32xf32>
    %211 = math.tanh %210 : vector<2x32xf32>
    %212 = arith.mulf %207, %211 : vector<2x32xf32>
    %c0_60 = arith.constant 0 : index
    %c0_61 = arith.constant 0 : index
    %213 = vector.load %arg14[%c0_60, %c0_61] : memref<16x32xf32, #tpu.memory_space<vmem>>, vector<2x32xf32>
    tpu.vector_store %arg14[%c0_60, %c0_61], %212 {strides = array<i32>} : memref<16x32xf32, #tpu.memory_space<vmem>>, vector<2x32xf32>,
    %214 = vector.extract_strided_slice %189 {offsets = [2, 0], sizes = [2, 128], strides = [1, 1]} : vector<16x128xf32> to vector<2x128xf32>
    %cst_62 = arith.constant dense<0.000000e+00> : vector<2x128xf32>
    %215 = tpu.matmul %212, %184, %cst_62 {dimension_numbers = #tpu.dot_dimension_numbers<[1], [0], [0], [1], [0, 0, 1, 1], [], []>} : vector<2x32xf32>, vector<32x128xf32>, vector<2x128xf32> -> vector<2x128xf32>
    %216 = arith.addf %214, %215 : vector<2x128xf32>
    %217 = math.tanh %216 : vector<2x128xf32>
    %218 = arith.negf %216 : vector<2x128xf32>
    %219 = math.exp %218 : vector<2x128xf32>
    %cst_63 = arith.constant 1.000000e+00 : f32
    %220 = vector.broadcast %cst_63 : f32 to vector<2x128xf32>
    %221 = arith.addf %220, %219 : vector<2x128xf32>
    %222 = arith.divf %220, %221 : vector<2x128xf32>
    %223 = arith.select %5, %217, %222 : vector<2x128xi1>, vector<2x128xf32>
    %224 = vector.extract_strided_slice %223 {offsets = [0, 0], sizes = [2, 32], strides = [1, 1]} : vector<2x128xf32> to vector<2x32xf32>
    %225 = vector.extract_strided_slice %223 {offsets = [0, 32], sizes = [2, 32], strides = [1, 1]} : vector<2x128xf32> to vector<2x32xf32>
    %226 = vector.extract_strided_slice %223 {offsets = [0, 64], sizes = [2, 32], strides = [1, 1]} : vector<2x128xf32> to vector<2x32xf32>
    %227 = vector.extract_strided_slice %223 {offsets = [0, 96], sizes = [2, 32], strides = [1, 1]} : vector<2x128xf32> to vector<2x32xf32>
    %228 = arith.mulf %225, %210 : vector<2x32xf32>
    %229 = arith.mulf %224, %226 : vector<2x32xf32>
    %230 = arith.addf %228, %229 : vector<2x32xf32>
    %231 = math.tanh %230 : vector<2x32xf32>
    %232 = arith.mulf %227, %231 : vector<2x32xf32>
    %c2_64 = arith.constant 2 : index
    %c0_65 = arith.constant 0 : index
    %233 = vector.load %arg14[%c2_64, %c0_65] : memref<16x32xf32, #tpu.memory_space<vmem>>, vector<2x32xf32>
    tpu.vector_store %arg14[%c2_64, %c0_65], %232 {strides = array<i32>} : memref<16x32xf32, #tpu.memory_space<vmem>>, vector<2x32xf32>,
    %234 = vector.extract_strided_slice %189 {offsets = [4, 0], sizes = [2, 128], strides = [1, 1]} : vector<16x128xf32> to vector<2x128xf32>
    %cst_66 = arith.constant dense<0.000000e+00> : vector<2x128xf32>
    %235 = tpu.matmul %232, %184, %cst_66 {dimension_numbers = #tpu.dot_dimension_numbers<[1], [0], [0], [1], [0, 0, 1, 1], [], []>} : vector<2x32xf32>, vector<32x128xf32>, vector<2x128xf32> -> vector<2x128xf32>
    %236 = arith.addf %234, %235 : vector<2x128xf32>
    %237 = math.tanh %236 : vector<2x128xf32>
    %238 = arith.negf %236 : vector<2x128xf32>
    %239 = math.exp %238 : vector<2x128xf32>
    %cst_67 = arith.constant 1.000000e+00 : f32
    %240 = vector.broadcast %cst_67 : f32 to vector<2x128xf32>
    %241 = arith.addf %240, %239 : vector<2x128xf32>
    %242 = arith.divf %240, %241 : vector<2x128xf32>
    %243 = arith.select %5, %237, %242 : vector<2x128xi1>, vector<2x128xf32>
    %244 = vector.extract_strided_slice %243 {offsets = [0, 0], sizes = [2, 32], strides = [1, 1]} : vector<2x128xf32> to vector<2x32xf32>
    %245 = vector.extract_strided_slice %243 {offsets = [0, 32], sizes = [2, 32], strides = [1, 1]} : vector<2x128xf32> to vector<2x32xf32>
    %246 = vector.extract_strided_slice %243 {offsets = [0, 64], sizes = [2, 32], strides = [1, 1]} : vector<2x128xf32> to vector<2x32xf32>
    %247 = vector.extract_strided_slice %243 {offsets = [0, 96], sizes = [2, 32], strides = [1, 1]} : vector<2x128xf32> to vector<2x32xf32>
    %248 = arith.mulf %245, %230 : vector<2x32xf32>
    %249 = arith.mulf %244, %246 : vector<2x32xf32>
    %250 = arith.addf %248, %249 : vector<2x32xf32>
    %251 = math.tanh %250 : vector<2x32xf32>
    %252 = arith.mulf %247, %251 : vector<2x32xf32>
    %c4_68 = arith.constant 4 : index
    %c0_69 = arith.constant 0 : index
    %253 = vector.load %arg14[%c4_68, %c0_69] : memref<16x32xf32, #tpu.memory_space<vmem>>, vector<2x32xf32>
    tpu.vector_store %arg14[%c4_68, %c0_69], %252 {strides = array<i32>} : memref<16x32xf32, #tpu.memory_space<vmem>>, vector<2x32xf32>,
    %254 = vector.extract_strided_slice %189 {offsets = [6, 0], sizes = [2, 128], strides = [1, 1]} : vector<16x128xf32> to vector<2x128xf32>
    %cst_70 = arith.constant dense<0.000000e+00> : vector<2x128xf32>
    %255 = tpu.matmul %252, %184, %cst_70 {dimension_numbers = #tpu.dot_dimension_numbers<[1], [0], [0], [1], [0, 0, 1, 1], [], []>} : vector<2x32xf32>, vector<32x128xf32>, vector<2x128xf32> -> vector<2x128xf32>
    %256 = arith.addf %254, %255 : vector<2x128xf32>
    %257 = math.tanh %256 : vector<2x128xf32>
    %258 = arith.negf %256 : vector<2x128xf32>
    %259 = math.exp %258 : vector<2x128xf32>
    %cst_71 = arith.constant 1.000000e+00 : f32
    %260 = vector.broadcast %cst_71 : f32 to vector<2x128xf32>
    %261 = arith.addf %260, %259 : vector<2x128xf32>
    %262 = arith.divf %260, %261 : vector<2x128xf32>
    %263 = arith.select %5, %257, %262 : vector<2x128xi1>, vector<2x128xf32>
    %264 = vector.extract_strided_slice %263 {offsets = [0, 0], sizes = [2, 32], strides = [1, 1]} : vector<2x128xf32> to vector<2x32xf32>
    %265 = vector.extract_strided_slice %263 {offsets = [0, 32], sizes = [2, 32], strides = [1, 1]} : vector<2x128xf32> to vector<2x32xf32>
    %266 = vector.extract_strided_slice %263 {offsets = [0, 64], sizes = [2, 32], strides = [1, 1]} : vector<2x128xf32> to vector<2x32xf32>
    %267 = vector.extract_strided_slice %263 {offsets = [0, 96], sizes = [2, 32], strides = [1, 1]} : vector<2x128xf32> to vector<2x32xf32>
    %268 = arith.mulf %265, %250 : vector<2x32xf32>
    %269 = arith.mulf %264, %266 : vector<2x32xf32>
    %270 = arith.addf %268, %269 : vector<2x32xf32>
    %271 = math.tanh %270 : vector<2x32xf32>
    %272 = arith.mulf %267, %271 : vector<2x32xf32>
    %c6_72 = arith.constant 6 : index
    %c0_73 = arith.constant 0 : index
    %273 = vector.load %arg14[%c6_72, %c0_73] : memref<16x32xf32, #tpu.memory_space<vmem>>, vector<2x32xf32>
    tpu.vector_store %arg14[%c6_72, %c0_73], %272 {strides = array<i32>} : memref<16x32xf32, #tpu.memory_space<vmem>>, vector<2x32xf32>,
    %274 = vector.extract_strided_slice %189 {offsets = [8, 0], sizes = [2, 128], strides = [1, 1]} : vector<16x128xf32> to vector<2x128xf32>
    %cst_74 = arith.constant dense<0.000000e+00> : vector<2x128xf32>
    %275 = tpu.matmul %272, %184, %cst_74 {dimension_numbers = #tpu.dot_dimension_numbers<[1], [0], [0], [1], [0, 0, 1, 1], [], []>} : vector<2x32xf32>, vector<32x128xf32>, vector<2x128xf32> -> vector<2x128xf32>
    %276 = arith.addf %274, %275 : vector<2x128xf32>
    %277 = math.tanh %276 : vector<2x128xf32>
    %278 = arith.negf %276 : vector<2x128xf32>
    %279 = math.exp %278 : vector<2x128xf32>
    %cst_75 = arith.constant 1.000000e+00 : f32
    %280 = vector.broadcast %cst_75 : f32 to vector<2x128xf32>
    %281 = arith.addf %280, %279 : vector<2x128xf32>
    %282 = arith.divf %280, %281 : vector<2x128xf32>
    %283 = arith.select %5, %277, %282 : vector<2x128xi1>, vector<2x128xf32>
    %284 = vector.extract_strided_slice %283 {offsets = [0, 0], sizes = [2, 32], strides = [1, 1]} : vector<2x128xf32> to vector<2x32xf32>
    %285 = vector.extract_strided_slice %283 {offsets = [0, 32], sizes = [2, 32], strides = [1, 1]} : vector<2x128xf32> to vector<2x32xf32>
    %286 = vector.extract_strided_slice %283 {offsets = [0, 64], sizes = [2, 32], strides = [1, 1]} : vector<2x128xf32> to vector<2x32xf32>
    %287 = vector.extract_strided_slice %283 {offsets = [0, 96], sizes = [2, 32], strides = [1, 1]} : vector<2x128xf32> to vector<2x32xf32>
    %288 = arith.mulf %285, %270 : vector<2x32xf32>
    %289 = arith.mulf %284, %286 : vector<2x32xf32>
    %290 = arith.addf %288, %289 : vector<2x32xf32>
    %291 = math.tanh %290 : vector<2x32xf32>
    %292 = arith.mulf %287, %291 : vector<2x32xf32>
    %c8_76 = arith.constant 8 : index
    %c0_77 = arith.constant 0 : index
    %293 = vector.load %arg14[%c8_76, %c0_77] : memref<16x32xf32, #tpu.memory_space<vmem>>, vector<2x32xf32>
    tpu.vector_store %arg14[%c8_76, %c0_77], %292 {strides = array<i32>} : memref<16x32xf32, #tpu.memory_space<vmem>>, vector<2x32xf32>,
    %294 = vector.extract_strided_slice %189 {offsets = [10, 0], sizes = [2, 128], strides = [1, 1]} : vector<16x128xf32> to vector<2x128xf32>
    %cst_78 = arith.constant dense<0.000000e+00> : vector<2x128xf32>
    %295 = tpu.matmul %292, %184, %cst_78 {dimension_numbers = #tpu.dot_dimension_numbers<[1], [0], [0], [1], [0, 0, 1, 1], [], []>} : vector<2x32xf32>, vector<32x128xf32>, vector<2x128xf32> -> vector<2x128xf32>
    %296 = arith.addf %294, %295 : vector<2x128xf32>
    %297 = math.tanh %296 : vector<2x128xf32>
    %298 = arith.negf %296 : vector<2x128xf32>
    %299 = math.exp %298 : vector<2x128xf32>
    %cst_79 = arith.constant 1.000000e+00 : f32
    %300 = vector.broadcast %cst_79 : f32 to vector<2x128xf32>
    %301 = arith.addf %300, %299 : vector<2x128xf32>
    %302 = arith.divf %300, %301 : vector<2x128xf32>
    %303 = arith.select %5, %297, %302 : vector<2x128xi1>, vector<2x128xf32>
    %304 = vector.extract_strided_slice %303 {offsets = [0, 0], sizes = [2, 32], strides = [1, 1]} : vector<2x128xf32> to vector<2x32xf32>
    %305 = vector.extract_strided_slice %303 {offsets = [0, 32], sizes = [2, 32], strides = [1, 1]} : vector<2x128xf32> to vector<2x32xf32>
    %306 = vector.extract_strided_slice %303 {offsets = [0, 64], sizes = [2, 32], strides = [1, 1]} : vector<2x128xf32> to vector<2x32xf32>
    %307 = vector.extract_strided_slice %303 {offsets = [0, 96], sizes = [2, 32], strides = [1, 1]} : vector<2x128xf32> to vector<2x32xf32>
    %308 = arith.mulf %305, %290 : vector<2x32xf32>
    %309 = arith.mulf %304, %306 : vector<2x32xf32>
    %310 = arith.addf %308, %309 : vector<2x32xf32>
    %311 = math.tanh %310 : vector<2x32xf32>
    %312 = arith.mulf %307, %311 : vector<2x32xf32>
    %c10_80 = arith.constant 10 : index
    %c0_81 = arith.constant 0 : index
    %313 = vector.load %arg14[%c10_80, %c0_81] : memref<16x32xf32, #tpu.memory_space<vmem>>, vector<2x32xf32>
    tpu.vector_store %arg14[%c10_80, %c0_81], %312 {strides = array<i32>} : memref<16x32xf32, #tpu.memory_space<vmem>>, vector<2x32xf32>,
    %314 = vector.extract_strided_slice %189 {offsets = [12, 0], sizes = [2, 128], strides = [1, 1]} : vector<16x128xf32> to vector<2x128xf32>
    %cst_82 = arith.constant dense<0.000000e+00> : vector<2x128xf32>
    %315 = tpu.matmul %312, %184, %cst_82 {dimension_numbers = #tpu.dot_dimension_numbers<[1], [0], [0], [1], [0, 0, 1, 1], [], []>} : vector<2x32xf32>, vector<32x128xf32>, vector<2x128xf32> -> vector<2x128xf32>
    %316 = arith.addf %314, %315 : vector<2x128xf32>
    %317 = math.tanh %316 : vector<2x128xf32>
    %318 = arith.negf %316 : vector<2x128xf32>
    %319 = math.exp %318 : vector<2x128xf32>
    %cst_83 = arith.constant 1.000000e+00 : f32
    %320 = vector.broadcast %cst_83 : f32 to vector<2x128xf32>
    %321 = arith.addf %320, %319 : vector<2x128xf32>
    %322 = arith.divf %320, %321 : vector<2x128xf32>
    %323 = arith.select %5, %317, %322 : vector<2x128xi1>, vector<2x128xf32>
    %324 = vector.extract_strided_slice %323 {offsets = [0, 0], sizes = [2, 32], strides = [1, 1]} : vector<2x128xf32> to vector<2x32xf32>
    %325 = vector.extract_strided_slice %323 {offsets = [0, 32], sizes = [2, 32], strides = [1, 1]} : vector<2x128xf32> to vector<2x32xf32>
    %326 = vector.extract_strided_slice %323 {offsets = [0, 64], sizes = [2, 32], strides = [1, 1]} : vector<2x128xf32> to vector<2x32xf32>
    %327 = vector.extract_strided_slice %323 {offsets = [0, 96], sizes = [2, 32], strides = [1, 1]} : vector<2x128xf32> to vector<2x32xf32>
    %328 = arith.mulf %325, %310 : vector<2x32xf32>
    %329 = arith.mulf %324, %326 : vector<2x32xf32>
    %330 = arith.addf %328, %329 : vector<2x32xf32>
    %331 = math.tanh %330 : vector<2x32xf32>
    %332 = arith.mulf %327, %331 : vector<2x32xf32>
    %c12_84 = arith.constant 12 : index
    %c0_85 = arith.constant 0 : index
    %333 = vector.load %arg14[%c12_84, %c0_85] : memref<16x32xf32, #tpu.memory_space<vmem>>, vector<2x32xf32>
    tpu.vector_store %arg14[%c12_84, %c0_85], %332 {strides = array<i32>} : memref<16x32xf32, #tpu.memory_space<vmem>>, vector<2x32xf32>,
    %334 = vector.extract_strided_slice %189 {offsets = [14, 0], sizes = [2, 128], strides = [1, 1]} : vector<16x128xf32> to vector<2x128xf32>
    %cst_86 = arith.constant dense<0.000000e+00> : vector<2x128xf32>
    %335 = tpu.matmul %332, %184, %cst_86 {dimension_numbers = #tpu.dot_dimension_numbers<[1], [0], [0], [1], [0, 0, 1, 1], [], []>} : vector<2x32xf32>, vector<32x128xf32>, vector<2x128xf32> -> vector<2x128xf32>
    %336 = arith.addf %334, %335 : vector<2x128xf32>
    %337 = math.tanh %336 : vector<2x128xf32>
    %338 = arith.negf %336 : vector<2x128xf32>
    %339 = math.exp %338 : vector<2x128xf32>
    %cst_87 = arith.constant 1.000000e+00 : f32
    %340 = vector.broadcast %cst_87 : f32 to vector<2x128xf32>
    %341 = arith.addf %340, %339 : vector<2x128xf32>
    %342 = arith.divf %340, %341 : vector<2x128xf32>
    %343 = arith.select %5, %337, %342 : vector<2x128xi1>, vector<2x128xf32>
    %344 = vector.extract_strided_slice %343 {offsets = [0, 0], sizes = [2, 32], strides = [1, 1]} : vector<2x128xf32> to vector<2x32xf32>
    %345 = vector.extract_strided_slice %343 {offsets = [0, 32], sizes = [2, 32], strides = [1, 1]} : vector<2x128xf32> to vector<2x32xf32>
    %346 = vector.extract_strided_slice %343 {offsets = [0, 64], sizes = [2, 32], strides = [1, 1]} : vector<2x128xf32> to vector<2x32xf32>
    %347 = vector.extract_strided_slice %343 {offsets = [0, 96], sizes = [2, 32], strides = [1, 1]} : vector<2x128xf32> to vector<2x32xf32>
    %348 = arith.mulf %345, %330 : vector<2x32xf32>
    %349 = arith.mulf %344, %346 : vector<2x32xf32>
    %350 = arith.addf %348, %349 : vector<2x32xf32>
    %351 = math.tanh %350 : vector<2x32xf32>
    %352 = arith.mulf %347, %351 : vector<2x32xf32>
    %c14_88 = arith.constant 14 : index
    %c0_89 = arith.constant 0 : index
    %353 = vector.load %arg14[%c14_88, %c0_89] : memref<16x32xf32, #tpu.memory_space<vmem>>, vector<2x32xf32>
    tpu.vector_store %arg14[%c14_88, %c0_89], %352 {strides = array<i32>} : memref<16x32xf32, #tpu.memory_space<vmem>>, vector<2x32xf32>,
    %c1_90 = arith.constant 1 : index
    %c0_91 = arith.constant 0 : index
    %c0_92 = arith.constant 0 : index
    %354 = vector.load %arg12[%c1_90, %c0_91, %c0_92] : memref<2x2x32xf32, #tpu.memory_space<vmem>>, vector<1x2x32xf32>
    %355 = vector.shape_cast %354 : vector<1x2x32xf32> to vector<2x32xf32>
    %356 = vector.shape_cast %352 : vector<2x32xf32> to vector<1x2x32xf32>
    tpu.vector_store %arg12[%c1_90, %c0_91, %c0_92], %356 {strides = array<i32>} : memref<2x2x32xf32, #tpu.memory_space<vmem>>, vector<1x2x32xf32>,
    %c1_93 = arith.constant 1 : index
    %c0_94 = arith.constant 0 : index
    %c0_95 = arith.constant 0 : index
    %357 = vector.load %arg13[%c1_93, %c0_94, %c0_95] : memref<2x2x32xf32, #tpu.memory_space<vmem>>, vector<1x2x32xf32>
    %358 = vector.shape_cast %357 : vector<1x2x32xf32> to vector<2x32xf32>
    %359 = vector.shape_cast %350 : vector<2x32xf32> to vector<1x2x32xf32>
    tpu.vector_store %arg13[%c1_93, %c0_94, %c0_95], %359 {strides = array<i32>} : memref<2x2x32xf32, #tpu.memory_space<vmem>>, vector<1x2x32xf32>,
    %c14_96 = arith.constant 14 : index
    %c0_97 = arith.constant 0 : index
    %360 = vector.load %arg14[%c14_96, %c0_97] : memref<16x32xf32, #tpu.memory_space<vmem>>, vector<2x32xf32>
    %c0_98 = arith.constant 0 : index
    %c0_99 = arith.constant 0 : index
    %361 = vector.load %arg9[%c0_98, %c0_99] : memref<32x4xf32, #tpu.memory_space<vmem>>, vector<32x4xf32>
    %cst_100 = arith.constant dense<0.000000e+00> : vector<2x4xf32>
    %362 = tpu.matmul %360, %361, %cst_100 {dimension_numbers = #tpu.dot_dimension_numbers<[1], [0], [0], [1], [0, 0, 1, 1], [], []>} : vector<2x32xf32>, vector<32x4xf32>, vector<2x4xf32> -> vector<2x4xf32>
    %c0_101 = arith.constant 0 : index
    %c0_102 = arith.constant 0 : index
    %363 = vector.load %arg10[%c0_101, %c0_102] : memref<1x4xf32, #tpu.memory_space<vmem>>, vector<1x4xf32>
    %364 = vector.broadcast %363 : vector<1x4xf32> to vector<2x4xf32>
    %365 = arith.addf %362, %364 : vector<2x4xf32>
    %c0_103 = arith.constant 0 : index
    %c0_104 = arith.constant 0 : index
    %366 = vector.load %arg11[%c0_103, %c0_104] : memref<2x4xf32, #tpu.memory_space<vmem>>, vector<2x4xf32>
    tpu.vector_store %arg11[%c0_103, %c0_104], %365 {strides = array<i32>} : memref<2x4xf32, #tpu.memory_space<vmem>>, vector<2x4xf32>,
    return
  }
}

</mosaic_0001>

<bundles_post_ra>
// kernel: tpu_custom_call.1
= control target key start
LH: loop header
LB: loop body
LE: loop exit
PB: predicated region body
PF: predicated region fallthrough
CT: control target
= control target key end

     0   :  { %19 = vsyncpa [#allocation4], 0  ;;  %s3586_s0 = inlined_call_operand.vmem [shape: f32[16,16], index: 0, kind: input, shape index: {}]   ;;  %s3587_s1 = inlined_call_operand.hbm [shape: f32[2,2,32], index: 1, kind: input, shape index: {}]   ;;  %s3588_s2 = inlined_call_operand.hbm [shape: f32[2,2,32], index: 2, kind: input, shape index: {}]   ;;  %s3589_s3 = inlined_call_operand.hbm [shape: f32[16,128], index: 3, kind: input, shape index: {}]   ;;  %s3590_s4 = inlined_call_operand.vmem [shape: f32[32,128], index: 4, kind: input, shape index: {}]   ;;  %s3591_s5 = inlined_call_operand.vmem [shape: f32[1,128], index: 5, kind: input, shape index: {}]   ;;  %s3592_s6 = inlined_call_operand.hbm [shape: f32[32,128], index: 6, kind: input, shape index: {}]   ;;  %s3593_s7 = inlined_call_operand.hbm [shape: f32[32,128], index: 7, kind: input, shape index: {}]   ;;  %s3594_s8 = inlined_call_operand.vmem [shape: f32[1,128], index: 8, kind: input, shape index: {}]   ;;  %s3595_s9 = inlined_call_operand.vmem [shape: f32[32,4], index: 9, kind: input, shape index: {}]   ;;  %s3596_s10 = inlined_call_operand.vmem [shape: f32[1,4], index: 10, kind: input, shape index: {}]   ;;  %s3597_s11 = inlined_call_operand.hbm [shape: f32[2,4], index: 11, kind: output, shape index: {0}]   ;;  %s3598_s12 = inlined_call_operand.hbm [shape: f32[2,2,32], index: 12, kind: output, shape index: {1}]   ;;  %s3599_s13 = inlined_call_operand.hbm [shape: f32[2,2,32], index: 13, kind: output, shape index: {2}]  }
   0x1   :  { %20 = vsyncpa [#allocation7], 0 }
   0x2   :  { %21 = vsyncpa [#allocation10], 0 }
   0x3   :  { %22 = vsyncpa [#allocation5], 0 }
   0x4   :  { %23 = vsyncpa [#allocation14], 0  ;;  %s3022_s25 = smov [#allocation6]   ;;  %s2836_s29 = scalar_lea.hbm %s3588_s2, 64 }
   0x5   :  { %s43_s26 = sshll.u32 %s3022_s25, 4  ;;  %p2837_p0 = scmp.ne.s32.totalorder %s3588_s2, %s2836_s29  ;;  %s44_s26 = int_to_ptr.vmem [resolvable:$true] %s43_s26 }
   0x6   :  { %p2840_p1 = scmp.lt.u32.totalorder %s2836_s29, %s3588_s2 }
   0x8   :  { %p2842_p2 = pnand %p2840_p1, %p2837_p0 }
   0xa   :  { %2845 = shalt.err (!%p2842_p2)
}
   0xb   :  { %s2846_s17 = scalar_lea.vmem %s44_s26, 64  ;;  %p2851_p4 = scmp.lt.s32.totalorder %s44_s26, %s44_s26 }
   0xc   :  { %p2847_p3 = scmp.ne.s32.totalorder %s44_s26, %s2846_s17  ;;  %p2852_p5 = scmp.lt.s32.totalorder %s2846_s17, %s2846_s17 }
   0xe   :  { %p2853_p6 = por %p2852_p5, %p2851_p4 }
  0x10   :  { %p2854_p7 = pnand %p2853_p6, %p2847_p3 }
  0x12   :  { %2857 = shalt.err (!%p2854_p7)
}
  0x13   :  { %s3023_s18 = smov 32   ;;  %s3024_s19 = smov 2  }
  0x14   :  { %49 = dma.hbm_to_vmem [thread:$0]  %s3588_s2, 64, %s44_s26, [#allocation7], %s3023_s18, %s3023_s18, %s3024_s19  }
  0x15   :  { %s3025_s22 = smov [#allocation9]   ;;  %s3026_s24 = smov [#allocation3]  }
  0x16   :  { %s71_s23 = sshll.u32 %s3025_s22, 4  ;;  %s31_s25 = sshll.u32 %s3026_s24, 4  ;;  %s72_s23 = int_to_ptr.vmem [resolvable:$true] %s71_s23  ;;  %s32_s25 = int_to_ptr.vmem [resolvable:$true] %s31_s25 }
  0x17   :  { %s2858_s29 = scalar_lea.hbm %s3592_s6, 512 }
  0x18   :  { %p2859_p8 = scmp.ne.s32.totalorder %s3592_s6, %s2858_s29  ;;  %p2862_p9 = scmp.lt.u32.totalorder %s2858_s29, %s3592_s6 }
  0x1a   :  { %p2864_p10 = pnand %p2862_p9, %p2859_p8 }
  0x1c   :  { %2867 = shalt.err (!%p2864_p10)
}
  0x1d   :  { %s2868_s2 = scalar_lea.vmem %s72_s23, 512  ;;  %p2873_p12 = scmp.lt.s32.totalorder %s72_s23, %s72_s23 }
  0x1e   :  { %p2869_p11 = scmp.ne.s32.totalorder %s72_s23, %s2868_s2  ;;  %p2874_p13 = scmp.lt.s32.totalorder %s2868_s2, %s2868_s2 }
  0x20   :  { %p2875_p0 = por %p2874_p13, %p2873_p12 }
  0x22   :  { %p2876_p1 = pnand %p2875_p0, %p2869_p11 }
  0x24   :  { %2879 = shalt.err (!%p2876_p1)
}
  0x25   :  { %s3027_s26 = smov 128   ;;  %s3028_s17 = smov 8  }
  0x26   :  { %77 = dma.hbm_to_vmem [thread:$0]  %s3592_s6, 512, %s72_s23, [#allocation10], %s3027_s26, %s3027_s26, %s3028_s17  }
  0x27   :  { %s2880_s27 = scalar_lea.hbm %s3587_s1, 64 }
  0x28   :  { %p2881_p2 = scmp.ne.s32.totalorder %s3587_s1, %s2880_s27  ;;  %p2884_p3 = scmp.lt.u32.totalorder %s2880_s27, %s3587_s1 }
  0x2a   :  { %p2886_p4 = pnand %p2884_p3, %p2881_p2 }
  0x2c   :  { %2889 = shalt.err (!%p2886_p4)
}
  0x2d   :  { %s2890_s15 = scalar_lea.vmem %s32_s25, 64  ;;  %p2895_p6 = scmp.lt.s32.totalorder %s32_s25, %s32_s25 }
  0x2e   :  { %p2891_p5 = scmp.ne.s32.totalorder %s32_s25, %s2890_s15  ;;  %p2896_p7 = scmp.lt.s32.totalorder %s2890_s15, %s2890_s15 }
  0x30   :  { %p2897_p8 = por %p2896_p7, %p2895_p6 }
  0x32   :  { %p2898_p9 = pnand %p2897_p8, %p2891_p5 }
  0x34   :  { %2901 = shalt.err (!%p2898_p9)
}
  0x35   :  { %37 = dma.hbm_to_vmem [thread:$0]  %s3587_s1, 64, %s32_s25, [#allocation4], %s3023_s18, %s3023_s18, %s3024_s19  }
  0x36   :  { %s3029_s16 = smov [#allocation8]   ;;  %s3030_s20 = smov [#allocation11]  }
  0x37   :  { %s55_s2 = sshll.u32 %s3029_s16, 4  ;;  %s83_s21 = sshll.u32 %s3030_s20, 4  ;;  %s56_s2 = int_to_ptr.vmem [resolvable:$true] %s55_s2  ;;  %s84_s21 = int_to_ptr.vmem [resolvable:$true] %s83_s21 }
  0x38   :  { %s2902_s27 = scalar_lea.hbm %s3589_s3, 256 }
  0x39   :  { %p2903_p10 = scmp.ne.s32.totalorder %s3589_s3, %s2902_s27  ;;  %p2906_p11 = scmp.lt.u32.totalorder %s2902_s27, %s3589_s3 }
  0x3b   :  { %p2908_p12 = pnand %p2906_p11, %p2903_p10 }
  0x3d   :  { %2911 = shalt.err (!%p2908_p12)
}
  0x3e   :  { %s2912_s1 = scalar_lea.vmem %s56_s2, 256  ;;  %p2917_p0 = scmp.lt.s32.totalorder %s56_s2, %s56_s2 }
  0x3f   :  { %p2913_p13 = scmp.ne.s32.totalorder %s56_s2, %s2912_s1  ;;  %p2918_p1 = scmp.lt.s32.totalorder %s2912_s1, %s2912_s1 }
  0x41   :  { %p2919_p2 = por %p2918_p1, %p2917_p0 }
  0x43   :  { %p2920_p3 = pnand %p2919_p2, %p2913_p13 }
  0x45   :  { %2923 = shalt.err (!%p2920_p3)
}
  0x46   :  { %61 = dma.hbm_to_vmem [thread:$0]  %s3589_s3, 256, %s56_s2, [#allocation7], %s3027_s26, %s3027_s26, %s3028_s17  }
  0x47   :  { %s2924_s16 = scalar_lea.hbm %s3593_s7, 512 }
  0x48   :  { %p2925_p4 = scmp.ne.s32.totalorder %s3593_s7, %s2924_s16  ;;  %p2928_p5 = scmp.lt.u32.totalorder %s2924_s16, %s3593_s7 }
  0x4a   :  { %p2930_p6 = pnand %p2928_p5, %p2925_p4 }
  0x4c   :  { %2933 = shalt.err (!%p2930_p6)
}
  0x4d   :  { %s2934_s28 = scalar_lea.vmem %s84_s21, 512  ;;  %p2939_p8 = scmp.lt.s32.totalorder %s84_s21, %s84_s21 }
  0x4e   :  { %p2935_p7 = scmp.ne.s32.totalorder %s84_s21, %s2934_s28  ;;  %p2940_p9 = scmp.lt.s32.totalorder %s2934_s28, %s2934_s28 }
  0x50   :  { %p2941_p10 = por %p2940_p9, %p2939_p8 }
  0x52   :  { %p2942_p11 = pnand %p2941_p10, %p2935_p7 }
  0x54   :  { %2945 = shalt.err (!%p2942_p11)
}
  0x55   :  { %89 = dma.hbm_to_vmem [thread:$0]  %s3593_s7, 512, %s84_s21, [#allocation10], %s3027_s26, %s3027_s26, %s3028_s17  }
  0x56   :  { %3012 = dma.done.wait [#allocation4], 64  }
  0x57   :  { %3013 = vsyncadd [#allocation4], 4294967232 }
  0x58   :  { %3014 = dma.done.wait [#allocation7], 320  }
  0x59   :  { %3015 = vsyncadd [#allocation7], 4294966976 }
  0x5a   :  { %3016 = dma.done.wait [#allocation10], 1024  }
  0x5b   :  { %3017 = vsyncadd [#allocation10], 4294966272  ;;  %v3031_v0 = vmov 0.0|0.0   ;;  %vm3032_vm0 = vmmov 0   ;;  %v3033_v1 = vmov 0.0   ;;  %vm131_vm1 = vcmask 130048  }
  0x5c   :  { %2581 = vmatprep.subr.bf16.mxu1 %v3031_v0  ;;  %2387 = vmatprep.mubr.msk.f32.mxu1 %vm3032_vm0, %v3033_v1  ;;  %v116_v2 = vld [vmem:[#allocation8] sm:$0xff]  ;;  %v117_v3 = vld [vmem:[#allocation8 + $0x8] sm:$0xff]  ;;  %v119_v6 = vld [vmem:[%s3590_s4 + $0x8] sm:$0xff]  ;;  %vm215_vm2 = vcmask 261120   ;;  %v111_v24 = vlaneseq  ;;  %vm323_vm6 = vcmask 254976   ;;  %vm433_vm7 = vcmask 257026  }
  0x5d   :  { %v118_v4 = vld [vmem:[%s3590_s4] sm:$0xff]  ;;  %v2577_v5 = vpack.c.bf16 %v117_v3, %v116_v2  ;;  %v120_v9 = vld [vmem:[%s3590_s4 + $0x10] sm:$0xff]  ;;  %v121_v10 = vld [vmem:[%s3590_s4 + $0x18] sm:$0xff]  ;;  %vm659_vm8 = vcmask 261126   ;;  %vm546_vm9 = vcmask 259076  }
  0x5e   :  { %v123_v7 = vld [vmem:[%s3586_s0] sm:$0xff]  ;;  %v3196_v8 = vpack.c.bf16 %v119_v6, %v118_v4  ;;  %v124_v11 = vld [vmem:[%s3586_s0 + $0x8] sm:$0xff]  ;;  %v3209_v12 = vpack.c.bf16 %v121_v10, %v120_v9  ;;  %v213_v13 = vld [vmem:[#allocation3] sm:$0x3]  ;;  %v112_v26 = vand.u32 127, %v111_v24 }
  0x5f   :  { %2376 = vmatprep.mubr.msk.f32.mxu0 %vm131_vm1, %v123_v7  ;;  %2578 = vmatprep.subr.bf16.mxu0 %v2577_v5  ;;  %v2237_v14 = vld [vmem:[%s3591_s5] ss:$0 sm:$0xff]  ;;  %s3034_s5 = smov 64   ;;  %v214_v31 = vld [vmem:[#allocation6] sm:$0x3] }
  0x60   :  { %2583 = vmatpush3.bf16.msra.mxu1 %v3196_v8  ;;  %2580 = vmatpush3.bf16.msra.mxu0 %v2577_v5  ;;  %vm113_vm3 = vcmp.ge.s32.totalorder %v112_v26, 64  ;;  %vm114_vm4 = vcmp.lt.s32.totalorder %v112_v26, 96  ;;  %v2103_v27 = vld [vmem:[%s3595_s9] sm:$0xff] }
  0x61   :  { %2584 = vmatprep.subr.bf16.mxu1 %v3031_v0  ;;  %2587 = vmatprep.subr.bf16.mxu0 %v3031_v0  ;;  %vm3237_vm5 = vmand %vm113_vm3, %vm114_vm4 }
  0x63   :  { %2377 = vmatmul.mubr.msk.f32.vlgmr.msra.gmra.mrb[0].mxu0 %vm131_vm1, %v124_v11 }
  0x64   :  { %2586 = vmatpush3.bf16.msra.mxu1 %v3209_v12  ;;  %2589 = vmatpush3.bf16.msra.mxu0 %v3196_v8 }
  0x65   :  { %2590 = vmatprep.subr.bf16.mxu0 %v3031_v0  ;;  %2398 = vmatprep.mubr.msk.f32.mxu0 %vm3032_vm0, %v3033_v1 }
  0x66   :  { %2593 = vmatprep.subr.bf16.mxu1 %v3031_v0 }
  0x67   :  { %2388 = vmatmul.mubr.msk.f32.vlgmr.msra.gmra.mrb[0].mxu1 %vm215_vm2, %v213_v13 }
  0x68   :  { %2592 = vmatpush3.bf16.msra.mxu0 %v3209_v12  ;;  %2595 = vmatpush3.bf16.msra.mxu1 %v3196_v8 }
  0x69   :  { %2596 = vmatprep.subr.bf16.mxu1 %v3031_v0  ;;  %2409 = vmatprep.mubr.msk.f32.mxu1 %vm3032_vm0, %v3033_v1 }
  0x6a   :  { %2599 = vmatprep.subr.bf16.mxu0 %v3031_v0 }
  0x6c   :  { %2598 = vmatpush3.bf16.msra.mxu1 %v3209_v12 }
  0x6d   :  { %2605 = vmatprep.subr.bf16.mxu1 %v3031_v0 }
 0x136   :  { %v2378_v15 = vpop.f32.mrb[0].mxu0 }
 0x137   :  { %v3232_v16 = vadd.f32 %v2378_v15, %v2237_v14  ;;  %v204_v17 = vpop.f32.mrb[1].mxu0 }
 0x138   :  { %v3234_v18 = vadd.f32 %v2237_v14, %v204_v17 }
 0x13a   :  { %v285_v19 = vpop.f32.mrb[0].mxu1 }
 0x13b   :  { %v289_v20 = vadd.f32 %v285_v19, %v3234_v18  ;;  %v2389_v21 = vpop.f32.mrb[1].mxu1 }
 0x13d   :  { %v2241_v22 = vmul.f32 -1.442695, %v289_v20 }
 0x13f   :  { %2708 = vpow2.f32 %v2241_v22 }
 0x140   :  { %2710 = vtanh.f32 %v289_v20 }
 0x149   :  { %v2709_v23 = vpop.eup %2708 }
 0x14a   :  { %v294_v25 = vadd.f32 1.0, %v2709_v23  ;;  %v2711_v28 = vpop.eup %2710 }
 0x14c   :  { %2712 = vrcp.f32 %v294_v25 }
 0x156   :  { %v2713_v29 = vpop.eup %2712 }
 0x157   :  { %v297_v30 = vsel %vm3237_vm5, %v2711_v28, %v2713_v29 }
 0x158   :  { %304 = vrot.lane.b32.xlu0 %v297_v30, %s3034_s5 }
 0x15c   :  { %299 = vrot.lane.b32.xlu0 %v214_v31, %s3023_s18 }
 0x1ca   :  { %v305_v32 = vpop.permute.xlu0 %304 }
 0x1cb   :  { %v307_v33 = vmul.f32 %v305_v32, %v297_v30 }
 0x1cd   :  { %309 = vrot.lane.b32.xlu1 %v307_v33, %s3023_s18 }
 0x1ce   :  { %v300_v34 = vpop.permute.xlu0 %299 }
 0x1cf   :  { %v302_v35 = vmul.f32 %v300_v34, %v297_v30 }
 0x23f   :  { %v310_v36 = vpop.permute.xlu1 %309 }
 0x240   :  { %v312_v37 = vadd.f32 %v310_v36, %v302_v35 }
 0x242   :  { %2714 = vtanh.f32 %v312_v37  ;;  %v410_v54 = vrot.slane %v312_v37, 6 }
 0x24c   :  { %v2715_v38 = vpop.eup %2714 }
 0x24d   :  { %315 = vrot.lane.b32.xlu1 %v2715_v38, %s3034_s5 }
 0x2bf   :  { %v316_v39 = vpop.permute.xlu1 %315 }
 0x2c0   :  { %v318_v40 = vmul.f32 %v316_v39, %v297_v30 }
 0x2c2   :  { %320 = vrot.lane.b32.xlu0 %v318_v40, %s3023_s18 }
 0x334   :  { %v321_v41 = vpop.permute.xlu0 %320 }
 0x335   :  { %324 = vst.msk [vmem:[#allocation2] sm:$0x3] %vm323_vm6, %v321_v41  ;;  %2399 = vmatmul.mubr.msk.f32.vlgmr.msra.gmra.mrb[2].mxu0 %vm215_vm2, %v321_v41 }
 0x336   :  { %2601 = vmatpush3.bf16.msra.mxu0 %v3196_v8  ;;  %2420 = vmatprep.mubr.msk.f32.mxu0 %vm3032_vm0, %v3033_v1 }
 0x337   :  { %2602 = vmatprep.subr.bf16.mxu0 %v3031_v0 }
 0x33a   :  { %2604 = vmatpush3.bf16.msra.mxu0 %v3209_v12 }
 0x33b   :  { %2611 = vmatprep.subr.bf16.mxu0 %v3031_v0 }
 0x408   :  { %v393_v42 = vpop.f32.mrb[2].mxu0 }
 0x409   :  { %v398_v43 = vrot.slane %v393_v42, 6  ;;  %v2400_v44 = vpop.f32.mrb[3].mxu0 }
 0x40b   :  { %v400_v45 = vadd.f32 %v398_v43, %v3234_v18 }
 0x40d   :  { %v2243_v46 = vmul.f32 -1.442695, %v400_v45 }
 0x40f   :  { %2716 = vpow2.f32 %v2243_v46 }
 0x410   :  { %2718 = vtanh.f32 %v400_v45 }
 0x419   :  { %v2717_v47 = vpop.eup %2716 }
 0x41a   :  { %v405_v48 = vadd.f32 1.0, %v2717_v47  ;;  %v2719_v49 = vpop.eup %2718 }
 0x41c   :  { %2720 = vrcp.f32 %v405_v48 }
 0x426   :  { %v2721_v50 = vpop.eup %2720 }
 0x427   :  { %v408_v51 = vsel %vm3237_vm5, %v2719_v49, %v2721_v50 }
 0x428   :  { %414 = vrot.lane.b32.xlu1 %v408_v51, %s3034_s5  ;;  %v412_v55 = vmul.f32 %v410_v54, %v408_v51 }
 0x49a   :  { %v415_v52 = vpop.permute.xlu1 %414 }
 0x49b   :  { %v417_v53 = vmul.f32 %v415_v52, %v408_v51 }
 0x49d   :  { %419 = vrot.lane.b32.xlu0 %v417_v53, %s3023_s18 }
 0x50f   :  { %v420_v56 = vpop.permute.xlu0 %419 }
 0x510   :  { %v422_v57 = vadd.f32 %v420_v56, %v412_v55 }
 0x512   :  { %2722 = vtanh.f32 %v422_v57  ;;  %v523_v15 = vrot.slane %v422_v57, 6 }
 0x51c   :  { %v2723_v58 = vpop.eup %2722 }
 0x51d   :  { %425 = vrot.lane.b32.xlu1 %v2723_v58, %s3034_s5 }
 0x58f   :  { %v426_v59 = vpop.permute.xlu1 %425 }
 0x590   :  { %v3262_v60 = vmul.f32 %v426_v59, %v408_v51 }
 0x592   :  { %v435_v61 = vrot.slane %v3262_v60, 2 }
 0x594   :  { %436 = vrot.lane.b32.xlu0 %v435_v61, %s3023_s18 }
 0x606   :  { %v437_v62 = vpop.permute.xlu0 %436 }
 0x607   :  { %2410 = vmatmul.mubr.msk.f32.vlgmr.msra.gmra.mrb[2].mxu1 %vm215_vm2, %v437_v62 }
 0x608   :  { %2607 = vmatpush3.bf16.msra.mxu1 %v3196_v8  ;;  %2431 = vmatprep.mubr.msk.f32.mxu1 %vm3032_vm0, %v3033_v1 }
 0x609   :  { %2608 = vmatprep.subr.bf16.mxu1 %v3031_v0 }
 0x60c   :  { %2610 = vmatpush3.bf16.msra.mxu1 %v3209_v12 }
 0x60d   :  { %2617 = vmatprep.subr.bf16.mxu1 %v3031_v0 }
 0x6da   :  { %v506_v63 = vpop.f32.mrb[2].mxu1 }
 0x6db   :  { %v511_v2 = vrot.slane %v506_v63, 4  ;;  %v2411_v3 = vpop.f32.mrb[3].mxu1 }
 0x6dd   :  { %v513_v4 = vadd.f32 %v511_v2, %v3234_v18 }
 0x6df   :  { %v2245_v5 = vmul.f32 -1.442695, %v513_v4 }
 0x6e1   :  { %2724 = vpow2.f32 %v2245_v5 }
 0x6e2   :  { %2726 = vtanh.f32 %v513_v4 }
 0x6eb   :  { %v2725_v6 = vpop.eup %2724 }
 0x6ec   :  { %v518_v7 = vadd.f32 1.0, %v2725_v6  ;;  %v2727_v9 = vpop.eup %2726 }
 0x6ee   :  { %2728 = vrcp.f32 %v518_v7 }
 0x6f8   :  { %v2729_v10 = vpop.eup %2728 }
 0x6f9   :  { %v521_v11 = vsel %vm3237_vm5, %v2727_v9, %v2729_v10 }
 0x6fa   :  { %527 = vrot.lane.b32.xlu1 %v521_v11, %s3034_s5  ;;  %v525_v17 = vmul.f32 %v523_v15, %v521_v11 }
 0x76c   :  { %v528_v13 = vpop.permute.xlu1 %527 }
 0x76d   :  { %v530_v14 = vmul.f32 %v528_v13, %v521_v11 }
 0x76f   :  { %532 = vrot.lane.b32.xlu0 %v530_v14, %s3023_s18 }
 0x7e1   :  { %v533_v19 = vpop.permute.xlu0 %532 }
 0x7e2   :  { %v535_v20 = vadd.f32 %v533_v19, %v525_v17 }
 0x7e4   :  { %2730 = vtanh.f32 %v535_v20  ;;  %v636_v39 = vrot.slane %v535_v20, 6 }
 0x7ee   :  { %v2731_v21 = vpop.eup %2730 }
 0x7ef   :  { %538 = vrot.lane.b32.xlu1 %v2731_v21, %s3034_s5 }
 0x861   :  { %v539_v22 = vpop.permute.xlu1 %538 }
 0x862   :  { %v3279_v23 = vmul.f32 %v539_v22, %v521_v11 }
 0x864   :  { %v548_v24 = vrot.slane %v3279_v23, 4 }
 0x866   :  { %549 = vrot.lane.b32.xlu0 %v548_v24, %s3023_s18 }
 0x8d8   :  { %v550_v25 = vpop.permute.xlu0 %549 }
 0x8d9   :  { %2421 = vmatmul.mubr.msk.f32.vlgmr.msra.gmra.mrb[4].mxu0 %vm215_vm2, %v550_v25 }
 0x8da   :  { %2613 = vmatpush3.bf16.msra.mxu0 %v3196_v8  ;;  %2442 = vmatprep.mubr.msk.f32.mxu0 %vm3032_vm0, %v3033_v1 }
 0x8db   :  { %2614 = vmatprep.subr.bf16.mxu0 %v3031_v0 }
 0x8de   :  { %2616 = vmatpush3.bf16.msra.mxu0 %v3209_v12 }
 0x8df   :  { %2623 = vmatprep.subr.bf16.mxu0 %v3031_v0 }
 0x9ac   :  { %v619_v26 = vpop.f32.mrb[4].mxu0 }
 0x9ad   :  { %v624_v28 = vrot.slane %v619_v26, 2  ;;  %v2422_v29 = vpop.f32.mrb[5].mxu0 }
 0x9af   :  { %v626_v30 = vadd.f32 %v624_v28, %v3234_v18 }
 0x9b1   :  { %v2247_v31 = vmul.f32 -1.442695, %v626_v30 }
 0x9b3   :  { %2732 = vpow2.f32 %v2247_v31 }
 0x9b4   :  { %2734 = vtanh.f32 %v626_v30 }
 0x9bd   :  { %v2733_v32 = vpop.eup %2732 }
 0x9be   :  { %v631_v33 = vadd.f32 1.0, %v2733_v32  ;;  %v2735_v34 = vpop.eup %2734 }
 0x9c0   :  { %2736 = vrcp.f32 %v631_v33 }
 0x9ca   :  { %v2737_v35 = vpop.eup %2736 }
 0x9cb   :  { %v634_v36 = vsel %vm3237_vm5, %v2735_v34, %v2737_v35 }
 0x9cc   :  { %640 = vrot.lane.b32.xlu1 %v634_v36, %s3034_s5  ;;  %v638_v40 = vmul.f32 %v636_v39, %v634_v36 }
 0xa3e   :  { %v641_v37 = vpop.permute.xlu1 %640 }
 0xa3f   :  { %v643_v38 = vmul.f32 %v641_v37, %v634_v36 }
 0xa41   :  { %645 = vrot.lane.b32.xlu0 %v643_v38, %s3023_s18 }
 0xab3   :  { %v646_v18 = vpop.permute.xlu0 %645 }
 0xab4   :  { %v648_v41 = vadd.f32 %v646_v18, %v638_v40 }
 0xab6   :  { %2738 = vtanh.f32 %v648_v41  ;;  %v746_v58 = vrot.slane %v648_v41, 6 }
 0xac0   :  { %v2739_v42 = vpop.eup %2738 }
 0xac1   :  { %651 = vrot.lane.b32.xlu1 %v2739_v42, %s3034_s5 }
 0xb33   :  { %v652_v43 = vpop.permute.xlu1 %651 }
 0xb34   :  { %v3296_v44 = vmul.f32 %v652_v43, %v634_v36 }
 0xb36   :  { %v661_v45 = vrot.slane %v3296_v44, 6 }
 0xb38   :  { %662 = vrot.lane.b32.xlu0 %v661_v45, %s3023_s18 }
 0xbaa   :  { %v663_v46 = vpop.permute.xlu0 %662 }
 0xbab   :  { %2432 = vmatmul.mubr.msk.f32.vlgmr.msra.gmra.mrb[4].mxu1 %vm215_vm2, %v663_v46 }
 0xbac   :  { %2619 = vmatpush3.bf16.msra.mxu1 %v3196_v8  ;;  %2453 = vmatprep.mubr.msk.f32.mxu1 %vm3032_vm0, %v3033_v1 }
 0xbad   :  { %2620 = vmatprep.subr.bf16.mxu1 %v3031_v0 }
 0xbb0   :  { %2622 = vmatpush3.bf16.msra.mxu1 %v3209_v12 }
 0xc7e   :  { %v732_v47 = vpop.f32.mrb[4].mxu1 }
 0xc7f   :  { %v736_v48 = vadd.f32 %v732_v47, %v3232_v16  ;;  %v2433_v49 = vpop.f32.mrb[5].mxu1 }
 0xc81   :  { %v2249_v50 = vmul.f32 -1.442695, %v736_v48 }
 0xc83   :  { %2740 = vpow2.f32 %v2249_v50 }
 0xc84   :  { %2742 = vtanh.f32 %v736_v48 }
 0xc8d   :  { %v2741_v51 = vpop.eup %2740 }
 0xc8e   :  { %v741_v52 = vadd.f32 1.0, %v2741_v51  ;;  %v2743_v53 = vpop.eup %2742 }
 0xc90   :  { %2744 = vrcp.f32 %v741_v52 }
 0xc9a   :  { %v2745_v54 = vpop.eup %2744 }
 0xc9b   :  { %v744_v55 = vsel %vm3237_vm5, %v2743_v53, %v2745_v54 }
 0xc9c   :  { %750 = vrot.lane.b32.xlu1 %v744_v55, %s3034_s5  ;;  %v748_v59 = vmul.f32 %v746_v58, %v744_v55 }
 0xd0e   :  { %v751_v56 = vpop.permute.xlu1 %750 }
 0xd0f   :  { %v753_v57 = vmul.f32 %v751_v56, %v744_v55 }
 0xd11   :  { %755 = vrot.lane.b32.xlu0 %v753_v57, %s3023_s18 }
 0xd83   :  { %v756_v61 = vpop.permute.xlu0 %755 }
 0xd84   :  { %v758_v62 = vadd.f32 %v756_v61, %v748_v59 }
 0xd86   :  { %2746 = vtanh.f32 %v758_v62  ;;  %v855_v19 = vrot.slane %v758_v62, 6 }
 0xd90   :  { %v2747_v63 = vpop.eup %2746 }
 0xd91   :  { %761 = vrot.lane.b32.xlu1 %v2747_v63, %s3034_s5 }
 0xe03   :  { %v762_v2 = vpop.permute.xlu1 %761 }
 0xe04   :  { %v764_v3 = vmul.f32 %v762_v2, %v744_v55 }
 0xe06   :  { %766 = vrot.lane.b32.xlu0 %v764_v3, %s3023_s18 }
 0xe78   :  { %v767_v4 = vpop.permute.xlu0 %766 }
 0xe79   :  { %769 = vst.msk [vmem:[#allocation2 + $0x8] sm:$0x3] %vm323_vm6, %v767_v4  ;;  %2443 = vmatmul.mubr.msk.f32.vlgmr.msra.gmra.mrb[6].mxu0 %vm215_vm2, %v767_v4 }
 0xe7a   :  { %2625 = vmatpush3.bf16.msra.mxu0 %v3196_v8  ;;  %2464 = vmatprep.mubr.msk.f32.mxu0 %vm3032_vm0, %v3033_v1 }
 0xe7b   :  { %2626 = vmatprep.subr.bf16.mxu0 %v3031_v0 }
 0xe7e   :  { %2628 = vmatpush3.bf16.msra.mxu0 %v3209_v12 }
 0xe7f   :  { %2637 = vmatprep.subr.bf16.mxu0 %v3031_v0 }
 0xf4c   :  { %v838_v5 = vpop.f32.mrb[6].mxu0 }
 0xf4d   :  { %v843_v6 = vrot.slane %v838_v5, 6  ;;  %v2444_v7 = vpop.f32.mrb[7].mxu0 }
 0xf4e   :  { %v1109_v7 = vld [vmem:[#allocation9] sm:$0xff] }
 0xf4f   :  { %v845_v9 = vadd.f32 %v843_v6, %v3232_v16 }
 0xf51   :  { %v2251_v10 = vmul.f32 -1.442695, %v845_v9 }
 0xf53   :  { %2748 = vpow2.f32 %v2251_v10 }
 0xf54   :  { %2750 = vtanh.f32 %v845_v9  ;;  %v1110_v9 = vld [vmem:[#allocation9 + $0x8] sm:$0xff] }
 0xf55   :  { %v2629_v10 = vpack.c.bf16 %v1110_v9, %v1109_v7 }
 0xf57   :  { %2630 = vmatprep.subr.bf16.mxu1 %v2629_v10 }
 0xf5d   :  { %v2749_v11 = vpop.eup %2748 }
 0xf5e   :  { %v850_v13 = vadd.f32 1.0, %v2749_v11  ;;  %v2751_v8 = vpop.eup %2750  ;;  %v1113_v11 = vld [vmem:[#allocation11] sm:$0xff] }
 0xf60   :  { %2752 = vrcp.f32 %v850_v13  ;;  %v1114_v13 = vld [vmem:[#allocation11 + $0x8] sm:$0xff] }
 0xf6a   :  { %v2753_v14 = vpop.eup %2752 }
 0xf6b   :  { %v853_v15 = vsel %vm3237_vm5, %v2751_v8, %v2753_v14  ;;  %v1111_v8 = vld [vmem:[#allocation9 + $0x10] sm:$0xff]  ;;  %v3363_v14 = vpack.c.bf16 %v1114_v13, %v1113_v11 }
 0xf6c   :  { %859 = vrot.lane.b32.xlu1 %v853_v15, %s3034_s5  ;;  %v857_v20 = vmul.f32 %v855_v19, %v853_v15 }
 0xfde   :  { %v860_v12 = vpop.permute.xlu1 %859 }
 0xfdf   :  { %v862_v17 = vmul.f32 %v860_v12, %v853_v15  ;;  %v1115_v12 = vld [vmem:[#allocation11 + $0x10] sm:$0xff] }
 0xfe1   :  { %864 = vrot.lane.b32.xlu0 %v862_v17, %s3023_s18  ;;  %v1116_v17 = vld [vmem:[#allocation11 + $0x18] sm:$0xff] }
0x1053   :  { %v865_v21 = vpop.permute.xlu0 %864 }
0x1054   :  { %v867_v22 = vadd.f32 %v865_v21, %v857_v20  ;;  %v1208_v20 = vld [vmem:[#allocation3 + $0x2] sm:$0x3] }
0x1056   :  { %2754 = vtanh.f32 %v867_v22  ;;  %v967_v41 = vrot.slane %v867_v22, 6 }
0x1060   :  { %v2755_v24 = vpop.eup %2754 }
0x1061   :  { %870 = vrot.lane.b32.xlu1 %v2755_v24, %s3034_s5 }
0x10d3   :  { %v871_v25 = vpop.permute.xlu1 %870 }
0x10d4   :  { %v3327_v26 = vmul.f32 %v871_v25, %v853_v15  ;;  %v1112_v15 = vld [vmem:[#allocation9 + $0x18] sm:$0xff]  ;;  %v1210_v25 = vld [vmem:[#allocation6 + $0x2] sm:$0x3] }
0x10d5   :  { %v2633_v19 = vpack.c.bf16 %v1112_v15, %v1111_v8 }
0x10d6   :  { %v879_v28 = vrot.slane %v3327_v26, 2 }
0x10d8   :  { %880 = vrot.lane.b32.xlu0 %v879_v28, %s3023_s18 }
0x114a   :  { %v881_v29 = vpop.permute.xlu0 %880 }
0x114b   :  { %2454 = vmatmul.mubr.msk.f32.vlgmr.msra.gmra.mrb[6].mxu1 %vm215_vm2, %v881_v29 }
0x114c   :  { %2632 = vmatpush3.bf16.msra.mxu1 %v2629_v10 }
0x114d   :  { %2634 = vmatprep.subr.bf16.mxu1 %v2633_v19 }
0x1150   :  { %2636 = vmatpush3.bf16.msra.mxu1 %v2633_v19 }
0x1151   :  { %2643 = vmatprep.subr.bf16.mxu1 %v3031_v0 }
0x121e   :  { %v950_v30 = vpop.f32.mrb[6].mxu1 }
0x121f   :  { %v955_v31 = vrot.slane %v950_v30, 4  ;;  %v2455_v32 = vpop.f32.mrb[7].mxu1 }
0x1221   :  { %v957_v33 = vadd.f32 %v955_v31, %v3232_v16 }
0x1223   :  { %v2253_v34 = vmul.f32 -1.442695, %v957_v33 }
0x1225   :  { %2756 = vpow2.f32 %v2253_v34 }
0x1226   :  { %2758 = vtanh.f32 %v957_v33  ;;  %v2256_v33 = vld [vmem:[%s3594_s8] ss:$0 sm:$0xff]  ;;  %s3035_s8 = smov 96  }
0x122f   :  { %v2757_v35 = vpop.eup %2756 }
0x1230   :  { %v962_v36 = vadd.f32 1.0, %v2757_v35  ;;  %v2759_v37 = vpop.eup %2758 }
0x1232   :  { %2760 = vrcp.f32 %v962_v36 }
0x123c   :  { %v2761_v38 = vpop.eup %2760 }
0x123d   :  { %v965_v39 = vsel %vm3237_vm5, %v2759_v37, %v2761_v38 }
0x123e   :  { %971 = vrot.lane.b32.xlu1 %v965_v39, %s3034_s5  ;;  %v969_v42 = vmul.f32 %v967_v41, %v965_v39 }
0x12b0   :  { %v972_v40 = vpop.permute.xlu1 %971 }
0x12b1   :  { %v974_v18 = vmul.f32 %v972_v40, %v965_v39 }
0x12b3   :  { %976 = vrot.lane.b32.xlu0 %v974_v18, %s3023_s18 }
0x1325   :  { %v977_v43 = vpop.permute.xlu0 %976 }
0x1326   :  { %v979_v45 = vadd.f32 %v977_v43, %v969_v42 }
0x1328   :  { %2762 = vtanh.f32 %v979_v45 }
0x1332   :  { %v2763_v46 = vpop.eup %2762 }
0x1333   :  { %982 = vrot.lane.b32.xlu1 %v2763_v46, %s3034_s5 }
0x13a5   :  { %v983_v47 = vpop.permute.xlu1 %982 }
0x13a6   :  { %v985_v48 = vmul.f32 %v983_v47, %v965_v39 }
0x13a8   :  { %v991_v49 = vrot.slane %v985_v48, 4 }
0x13aa   :  { %992 = vrot.lane.b32.xlu0 %v991_v49, %s3023_s18 }
0x141c   :  { %v993_v50 = vpop.permute.xlu0 %992 }
0x141d   :  { %2465 = vmatmul.mubr.msk.f32.vlgmr.msra.gmra.mrb[8].mxu0 %vm215_vm2, %v993_v50 }
0x141e   :  { %2486 = vmatprep.mubr.msk.f32.mxu0 %vm3032_vm0, %v3033_v1  ;;  %2639 = vmatpush3.bf16.msra.mxu0 %v3363_v14 }
0x141f   :  { %2640 = vmatprep.subr.bf16.mxu0 %v3031_v0 }
0x14f0   :  { %v1062_v51 = vpop.f32.mrb[8].mxu0 }
0x14f1   :  { %v1067_v52 = vrot.slane %v1062_v51, 2  ;;  %v2466_v53 = vpop.f32.mrb[9].mxu0 }
0x14f3   :  { %v1069_v54 = vadd.f32 %v1067_v52, %v3232_v16  ;;  %v1079_v16 = vrot.slane %v979_v45, 6 }
0x14f5   :  { %v2255_v55 = vmul.f32 -1.442695, %v1069_v54 }
0x14f7   :  { %2764 = vpow2.f32 %v2255_v55 }
0x14f8   :  { %2766 = vtanh.f32 %v1069_v54 }
0x1501   :  { %v2765_v56 = vpop.eup %2764 }
0x1502   :  { %v1074_v57 = vadd.f32 1.0, %v2765_v56  ;;  %v2767_v58 = vpop.eup %2766 }
0x1504   :  { %2768 = vrcp.f32 %v1074_v57 }
0x150e   :  { %v2769_v59 = vpop.eup %2768 }
0x150f   :  { %v1077_v61 = vsel %vm3237_vm5, %v2767_v58, %v2769_v59 }
0x1510   :  { %1083 = vrot.lane.b32.xlu1 %v1077_v61, %s3034_s5  ;;  %v1081_v2 = vmul.f32 %v1079_v16, %v1077_v61 }
0x1582   :  { %v1084_v62 = vpop.permute.xlu1 %1083 }
0x1583   :  { %v1086_v63 = vmul.f32 %v1084_v62, %v1077_v61 }
0x1585   :  { %1088 = vrot.lane.b32.xlu0 %v1086_v63, %s3023_s18 }
0x1589   :  { %430 = vrot.lane.b32.xlu0 %v3262_v60, %s3023_s18 }
0x158d   :  { %656 = vrot.lane.b32.xlu0 %v3296_v44, %s3023_s18 }
0x1591   :  { %987 = vrot.lane.b32.xlu0 %v985_v48, %s3023_s18 }
0x15f7   :  { %v1089_v3 = vpop.permute.xlu0 %1088 }
0x15f8   :  { %v3352_v4 = vadd.f32 %v1089_v3, %v1081_v2 }
0x15fa   :  { %2770 = vtanh.f32 %v3352_v4 }
0x15fb   :  { %v431_v5 = vpop.permute.xlu0 %430 }
0x15fc   :  { %434 = vst.msk [vmem:[#allocation2] sm:$0xc] %vm433_vm7, %v431_v5 }
0x15ff   :  { %v657_v6 = vpop.permute.xlu0 %656 }
0x1600   :  { %660 = vst.msk [vmem:[#allocation2] sm:$0xc0] %vm659_vm8, %v657_v6 }
0x1603   :  { %v988_v60 = vpop.permute.xlu0 %987 }
0x1604   :  { %v2771_v44 = vpop.eup %2770  ;;  %990 = vst.msk [vmem:[#allocation2 + $0x8] sm:$0x30] %vm546_vm9, %v988_v60 }
0x1605   :  { %1094 = vrot.lane.b32.xlu1 %v2771_v44, %s3034_s5 }
0x1609   :  { %543 = vrot.lane.b32.xlu1 %v3279_v23, %s3023_s18  ;;  %v3366_v23 = vpack.c.bf16 %v1116_v17, %v1115_v12 }
0x160b   :  { %2642 = vmatpush3.bf16.msra.mxu0 %v3366_v23 }
0x160c   :  { %2649 = vmatprep.subr.bf16.mxu0 %v3031_v0 }
0x160d   :  { %875 = vrot.lane.b32.xlu1 %v3327_v26, %s3023_s18 }
0x160e   :  { %2487 = vmatmul.mubr.msk.f32.vlgmr.msra.gmra.mrb[10].mxu0 %vm215_vm2, %v1208_v20 }
0x160f   :  { %2651 = vmatpush3.bf16.msra.mxu0 %v3363_v14  ;;  %2508 = vmatprep.mubr.msk.f32.mxu0 %vm3032_vm0, %v3033_v1 }
0x1610   :  { %2652 = vmatprep.subr.bf16.mxu0 %v3031_v0 }
0x1613   :  { %2654 = vmatpush3.bf16.msra.mxu0 %v3366_v23 }
0x1614   :  { %2661 = vmatprep.subr.bf16.mxu0 %v3031_v0 }
0x1677   :  { %v1095_v21 = vpop.permute.xlu1 %1094 }
0x1678   :  { %v1097_v22 = vmul.f32 %v1095_v21, %v1077_v61 }
0x167a   :  { %1099 = vrot.lane.b32.xlu1 %v1097_v22, %s3023_s18 }
0x167b   :  { %v544_v24 = vpop.permute.xlu1 %543 }
0x167c   :  { %547 = vst.msk [vmem:[#allocation2] sm:$0x30] %vm546_vm9, %v544_v24 }
0x167e   :  { %1294 = vrot.lane.b32.xlu1 %v1210_v25, %s3023_s18 }
0x167f   :  { %v876_v26 = vpop.permute.xlu1 %875 }
0x1680   :  { %878 = vst.msk [vmem:[#allocation2 + $0x8] sm:$0xc] %vm433_vm7, %v876_v26 }
0x1683   :  { %v1118_v28 = vld [vmem:[#allocation2] sm:$0xff] }
0x1684   :  { %2475 = vmatprep.mubr.msk.f32.mxu1 %vm215_vm2, %v1118_v28 }
0x16e1   :  { %v1280_v31 = vpop.f32.mrb[10].mxu0 }
0x16e2   :  { %v2488_v32 = vpop.f32.mrb[11].mxu0 }
0x16ec   :  { %v1100_v29 = vpop.permute.xlu1 %1099 }
0x16ed   :  { %1102 = vst.msk [vmem:[#allocation2 + $0x8] sm:$0xc0] %vm659_vm8, %v1100_v29  ;;  %1103 = vst.msk [vmem:[#allocation13 - $0x6] sm:$0xc0] %vm659_vm8, %v1100_v29 }
0x16f0   :  { %v1295_v47 = vpop.permute.xlu1 %1294 }
0x16f4   :  { %v1119_v30 = vld [vmem:[#allocation2 + $0x8] sm:$0xff] }
0x16f5   :  { %2476 = vmatmul.mubr.msk.f32.vlgmr.msra.gmra.mrb[8].mxu1 %vm215_vm2, %v1119_v30 }
0x16f6   :  { %2645 = vmatpush3.bf16.msra.mxu1 %v3363_v14  ;;  %2497 = vmatprep.mubr.msk.f32.mxu1 %vm3032_vm0, %v3033_v1 }
0x16f7   :  { %2646 = vmatprep.subr.bf16.mxu1 %v3031_v0 }
0x16fa   :  { %2648 = vmatpush3.bf16.msra.mxu1 %v3366_v23 }
0x16fb   :  { %2655 = vmatprep.subr.bf16.mxu1 %v3031_v0 }
0x17c8   :  { %v2477_v34 = vpop.f32.mrb[8].mxu1 }
0x17c9   :  { %v3396_v35 = vadd.f32 %v2477_v34, %v2256_v33  ;;  %v1198_v36 = vpop.f32.mrb[9].mxu1 }
0x17ca   :  { %v3398_v37 = vadd.f32 %v2256_v33, %v1198_v36 }
0x17cc   :  { %v1284_v38 = vadd.f32 %v1280_v31, %v3398_v37 }
0x17ce   :  { %v2260_v39 = vmul.f32 -1.442695, %v1284_v38 }
0x17d0   :  { %2772 = vpow2.f32 %v2260_v39 }
0x17d1   :  { %2774 = vtanh.f32 %v1284_v38 }
0x17da   :  { %v2773_v40 = vpop.eup %2772 }
0x17db   :  { %v1289_v18 = vadd.f32 1.0, %v2773_v40  ;;  %v2775_v41 = vpop.eup %2774 }
0x17dd   :  { %2776 = vrcp.f32 %v1289_v18 }
0x17e7   :  { %v2777_v42 = vpop.eup %2776 }
0x17e8   :  { %v1292_v43 = vsel %vm3237_vm5, %v2775_v41, %v2777_v42 }
0x17e9   :  { %1299 = vrot.lane.b32.xlu0 %v1292_v43, %s3034_s5  ;;  %v1297_v48 = vmul.f32 %v1295_v47, %v1292_v43 }
0x185b   :  { %v1300_v45 = vpop.permute.xlu0 %1299 }
0x185c   :  { %v1302_v46 = vmul.f32 %v1300_v45, %v1292_v43 }
0x185e   :  { %1304 = vrot.lane.b32.xlu0 %v1302_v46, %s3023_s18 }
0x18d0   :  { %v1305_v49 = vpop.permute.xlu0 %1304 }
0x18d1   :  { %v1307_v50 = vadd.f32 %v1305_v49, %v1297_v48 }
0x18d3   :  { %2778 = vtanh.f32 %v1307_v50  ;;  %v1404_v6 = vrot.slane %v1307_v50, 6 }
0x18dd   :  { %v2779_v51 = vpop.eup %2778 }
0x18de   :  { %1310 = vrot.lane.b32.xlu1 %v2779_v51, %s3034_s5 }
0x1950   :  { %v1311_v52 = vpop.permute.xlu1 %1310 }
0x1951   :  { %v1313_v53 = vmul.f32 %v1311_v52, %v1292_v43 }
0x1953   :  { %1315 = vrot.lane.b32.xlu0 %v1313_v53, %s3023_s18 }
0x19c5   :  { %v1316_v54 = vpop.permute.xlu0 %1315 }
0x19c6   :  { %1318 = vst.msk [vmem:[#allocation2] sm:$0x3] %vm323_vm6, %v1316_v54  ;;  %2498 = vmatmul.mubr.msk.f32.vlgmr.msra.gmra.mrb[10].mxu1 %vm215_vm2, %v1316_v54 }
0x19c7   :  { %2657 = vmatpush3.bf16.msra.mxu1 %v3363_v14  ;;  %2519 = vmatprep.mubr.msk.f32.mxu1 %vm3032_vm0, %v3033_v1 }
0x19c8   :  { %2658 = vmatprep.subr.bf16.mxu1 %v3031_v0 }
0x19cb   :  { %2660 = vmatpush3.bf16.msra.mxu1 %v3366_v23 }
0x19cc   :  { %2667 = vmatprep.subr.bf16.mxu1 %v3031_v0 }
0x1a99   :  { %v1387_v55 = vpop.f32.mrb[10].mxu1 }
0x1a9a   :  { %v1392_v56 = vrot.slane %v1387_v55, 6  ;;  %v2499_v57 = vpop.f32.mrb[11].mxu1 }
0x1a9c   :  { %v1394_v58 = vadd.f32 %v1392_v56, %v3398_v37 }
0x1a9e   :  { %v2262_v59 = vmul.f32 -1.442695, %v1394_v58 }
0x1aa0   :  { %2780 = vpow2.f32 %v2262_v59 }
0x1aa1   :  { %2782 = vtanh.f32 %v1394_v58 }
0x1aaa   :  { %v2781_v61 = vpop.eup %2780 }
0x1aab   :  { %v1399_v62 = vadd.f32 1.0, %v2781_v61  ;;  %v2783_v63 = vpop.eup %2782 }
0x1aad   :  { %2784 = vrcp.f32 %v1399_v62 }
0x1ab7   :  { %v2785_v16 = vpop.eup %2784 }
0x1ab8   :  { %v1402_v2 = vsel %vm3237_vm5, %v2783_v63, %v2785_v16 }
0x1ab9   :  { %1408 = vrot.lane.b32.xlu1 %v1402_v2, %s3034_s5  ;;  %v1406_v60 = vmul.f32 %v1404_v6, %v1402_v2 }
0x1b2b   :  { %v1409_v3 = vpop.permute.xlu1 %1408 }
0x1b2c   :  { %v1411_v5 = vmul.f32 %v1409_v3, %v1402_v2 }
0x1b2e   :  { %1413 = vrot.lane.b32.xlu0 %v1411_v5, %s3023_s18 }
0x1ba0   :  { %v1414_v44 = vpop.permute.xlu0 %1413 }
0x1ba1   :  { %v1416_v7 = vadd.f32 %v1414_v44, %v1406_v60 }
0x1ba3   :  { %2786 = vtanh.f32 %v1416_v7  ;;  %v1516_v30 = vrot.slane %v1416_v7, 6 }
0x1bad   :  { %v2787_v9 = vpop.eup %2786 }
0x1bae   :  { %1419 = vrot.lane.b32.xlu1 %v2787_v9, %s3034_s5 }
0x1c20   :  { %v1420_v10 = vpop.permute.xlu1 %1419 }
0x1c21   :  { %v3421_v11 = vmul.f32 %v1420_v10, %v1402_v2 }
0x1c23   :  { %v1428_v13 = vrot.slane %v3421_v11, 2 }
0x1c25   :  { %1429 = vrot.lane.b32.xlu0 %v1428_v13, %s3023_s18 }
0x1c97   :  { %v1430_v8 = vpop.permute.xlu0 %1429 }
0x1c98   :  { %2509 = vmatmul.mubr.msk.f32.vlgmr.msra.gmra.mrb[12].mxu0 %vm215_vm2, %v1430_v8 }
0x1c99   :  { %2663 = vmatpush3.bf16.msra.mxu0 %v3363_v14  ;;  %2530 = vmatprep.mubr.msk.f32.mxu0 %vm3032_vm0, %v3033_v1 }
0x1c9a   :  { %2664 = vmatprep.subr.bf16.mxu0 %v3031_v0 }
0x1c9d   :  { %2666 = vmatpush3.bf16.msra.mxu0 %v3366_v23 }
0x1c9e   :  { %2673 = vmatprep.subr.bf16.mxu0 %v3031_v0 }
0x1d6b   :  { %v1499_v15 = vpop.f32.mrb[12].mxu0 }
0x1d6c   :  { %v1504_v12 = vrot.slane %v1499_v15, 4  ;;  %v2510_v17 = vpop.f32.mrb[13].mxu0 }
0x1d6e   :  { %v1506_v19 = vadd.f32 %v1504_v12, %v3398_v37 }
0x1d70   :  { %v2264_v20 = vmul.f32 -1.442695, %v1506_v19 }
0x1d72   :  { %2788 = vpow2.f32 %v2264_v20 }
0x1d73   :  { %2790 = vtanh.f32 %v1506_v19 }
0x1d7c   :  { %v2789_v21 = vpop.eup %2788 }
0x1d7d   :  { %v1511_v22 = vadd.f32 1.0, %v2789_v21  ;;  %v2791_v24 = vpop.eup %2790 }
0x1d7f   :  { %2792 = vrcp.f32 %v1511_v22 }
0x1d89   :  { %v2793_v25 = vpop.eup %2792 }
0x1d8a   :  { %v1514_v26 = vsel %vm3237_vm5, %v2791_v24, %v2793_v25 }
0x1d8b   :  { %1520 = vrot.lane.b32.xlu1 %v1514_v26, %s3034_s5  ;;  %v1518_v31 = vmul.f32 %v1516_v30, %v1514_v26 }
0x1dfd   :  { %v1521_v28 = vpop.permute.xlu1 %1520 }
0x1dfe   :  { %v1523_v29 = vmul.f32 %v1521_v28, %v1514_v26 }
0x1e00   :  { %1525 = vrot.lane.b32.xlu0 %v1523_v29, %s3023_s18 }
0x1e72   :  { %v1526_v32 = vpop.permute.xlu0 %1525 }
0x1e73   :  { %v1528_v33 = vadd.f32 %v1526_v32, %v1518_v31 }
0x1e75   :  { %2794 = vtanh.f32 %v1528_v33  ;;  %v1628_v53 = vrot.slane %v1528_v33, 6 }
0x1e7f   :  { %v2795_v34 = vpop.eup %2794 }
0x1e80   :  { %1531 = vrot.lane.b32.xlu1 %v2795_v34, %s3034_s5 }
0x1ef2   :  { %v1532_v36 = vpop.permute.xlu1 %1531 }
0x1ef3   :  { %v3438_v38 = vmul.f32 %v1532_v36, %v1514_v26 }
0x1ef5   :  { %v1540_v39 = vrot.slane %v3438_v38, 4 }
0x1ef7   :  { %1541 = vrot.lane.b32.xlu0 %v1540_v39, %s3023_s18 }
0x1f69   :  { %v1542_v40 = vpop.permute.xlu0 %1541 }
0x1f6a   :  { %2520 = vmatmul.mubr.msk.f32.vlgmr.msra.gmra.mrb[12].mxu1 %vm215_vm2, %v1542_v40 }
0x1f6b   :  { %2669 = vmatpush3.bf16.msra.mxu1 %v3363_v14  ;;  %2541 = vmatprep.mubr.msk.f32.mxu1 %vm3032_vm0, %v3033_v1 }
0x1f6c   :  { %2670 = vmatprep.subr.bf16.mxu1 %v3031_v0 }
0x1f6f   :  { %2672 = vmatpush3.bf16.msra.mxu1 %v3366_v23 }
0x1f70   :  { %2679 = vmatprep.subr.bf16.mxu1 %v3031_v0 }
0x203d   :  { %v1611_v18 = vpop.f32.mrb[12].mxu1 }
0x203e   :  { %v1616_v41 = vrot.slane %v1611_v18, 2  ;;  %v2521_v42 = vpop.f32.mrb[13].mxu1 }
0x2040   :  { %v1618_v43 = vadd.f32 %v1616_v41, %v3398_v37 }
0x2042   :  { %v2266_v45 = vmul.f32 -1.442695, %v1618_v43 }
0x2044   :  { %2796 = vpow2.f32 %v2266_v45 }
0x2045   :  { %2798 = vtanh.f32 %v1618_v43 }
0x204e   :  { %v2797_v46 = vpop.eup %2796 }
0x204f   :  { %v1623_v47 = vadd.f32 1.0, %v2797_v46  ;;  %v2799_v48 = vpop.eup %2798 }
0x2051   :  { %2800 = vrcp.f32 %v1623_v47 }
0x205b   :  { %v2801_v49 = vpop.eup %2800 }
0x205c   :  { %v1626_v50 = vsel %vm3237_vm5, %v2799_v48, %v2801_v49 }
0x205d   :  { %1632 = vrot.lane.b32.xlu1 %v1626_v50, %s3034_s5  ;;  %v1630_v54 = vmul.f32 %v1628_v53, %v1626_v50 }
0x20cf   :  { %v1633_v51 = vpop.permute.xlu1 %1632 }
0x20d0   :  { %v1635_v52 = vmul.f32 %v1633_v51, %v1626_v50 }
0x20d2   :  { %1637 = vrot.lane.b32.xlu0 %v1635_v52, %s3023_s18 }
0x2144   :  { %v1638_v37 = vpop.permute.xlu0 %1637 }
0x2145   :  { %v1640_v55 = vadd.f32 %v1638_v37, %v1630_v54 }
0x2147   :  { %2802 = vtanh.f32 %v1640_v55  ;;  %v1737_v10 = vrot.slane %v1640_v55, 6 }
0x2151   :  { %v2803_v56 = vpop.eup %2802 }
0x2152   :  { %1643 = vrot.lane.b32.xlu1 %v2803_v56, %s3034_s5 }
0x21c4   :  { %v1644_v57 = vpop.permute.xlu1 %1643 }
0x21c5   :  { %v3455_v58 = vmul.f32 %v1644_v57, %v1626_v50 }
0x21c7   :  { %v1652_v59 = vrot.slane %v3455_v58, 6 }
0x21c9   :  { %1653 = vrot.lane.b32.xlu0 %v1652_v59, %s3023_s18 }
0x223b   :  { %v1654_v61 = vpop.permute.xlu0 %1653 }
0x223c   :  { %2531 = vmatmul.mubr.msk.f32.vlgmr.msra.gmra.mrb[14].mxu0 %vm215_vm2, %v1654_v61 }
0x223d   :  { %2675 = vmatpush3.bf16.msra.mxu0 %v3363_v14  ;;  %2552 = vmatprep.mubr.msk.f32.mxu0 %vm3032_vm0, %v3033_v1 }
0x223e   :  { %2676 = vmatprep.subr.bf16.mxu0 %v3031_v0 }
0x2241   :  { %2678 = vmatpush3.bf16.msra.mxu0 %v3366_v23 }
0x2242   :  { %2685 = vmatprep.subr.bf16.mxu0 %v3031_v0 }
0x230f   :  { %v1723_v62 = vpop.f32.mrb[14].mxu0 }
0x2310   :  { %v1727_v63 = vadd.f32 %v1723_v62, %v3396_v35  ;;  %v2532_v16 = vpop.f32.mrb[15].mxu0 }
0x2312   :  { %v2268_v2 = vmul.f32 -1.442695, %v1727_v63 }
0x2314   :  { %2804 = vpow2.f32 %v2268_v2 }
0x2315   :  { %2806 = vtanh.f32 %v1727_v63 }
0x231e   :  { %v2805_v3 = vpop.eup %2804 }
0x231f   :  { %v1732_v5 = vadd.f32 1.0, %v2805_v3  ;;  %v2807_v6 = vpop.eup %2806 }
0x2321   :  { %2808 = vrcp.f32 %v1732_v5 }
0x232b   :  { %v2809_v60 = vpop.eup %2808 }
0x232c   :  { %v1735_v44 = vsel %vm3237_vm5, %v2807_v6, %v2809_v60 }
0x232d   :  { %1741 = vrot.lane.b32.xlu1 %v1735_v44, %s3034_s5  ;;  %v1739_v13 = vmul.f32 %v1737_v10, %v1735_v44 }
0x239f   :  { %v1742_v7 = vpop.permute.xlu1 %1741 }
0x23a0   :  { %v1744_v9 = vmul.f32 %v1742_v7, %v1735_v44 }
0x23a2   :  { %1746 = vrot.lane.b32.xlu0 %v1744_v9, %s3023_s18 }
0x2414   :  { %v1747_v8 = vpop.permute.xlu0 %1746 }
0x2415   :  { %v1749_v15 = vadd.f32 %v1747_v8, %v1739_v13 }
0x2417   :  { %2810 = vtanh.f32 %v1749_v15  ;;  %v1846_v33 = vrot.slane %v1749_v15, 6 }
0x2421   :  { %v2811_v12 = vpop.eup %2810 }
0x2422   :  { %1752 = vrot.lane.b32.xlu1 %v2811_v12, %s3034_s5 }
0x2494   :  { %v1753_v17 = vpop.permute.xlu1 %1752 }
0x2495   :  { %v1755_v19 = vmul.f32 %v1753_v17, %v1735_v44 }
0x2497   :  { %1757 = vrot.lane.b32.xlu0 %v1755_v19, %s3023_s18 }
0x2509   :  { %v1758_v20 = vpop.permute.xlu0 %1757 }
0x250a   :  { %1760 = vst.msk [vmem:[#allocation2 + $0x8] sm:$0x3] %vm323_vm6, %v1758_v20  ;;  %2542 = vmatmul.mubr.msk.f32.vlgmr.msra.gmra.mrb[14].mxu1 %vm215_vm2, %v1758_v20 }
0x250b   :  { %2681 = vmatpush3.bf16.msra.mxu1 %v3363_v14  ;;  %2563 = vmatprep.mubr.msk.f32.mxu1 %vm3032_vm0, %v3033_v1 }
0x250c   :  { %2682 = vmatprep.subr.bf16.mxu1 %v3031_v0 }
0x250f   :  { %2684 = vmatpush3.bf16.msra.mxu1 %v3366_v23 }
0x25dd   :  { %v1829_v21 = vpop.f32.mrb[14].mxu1 }
0x25de   :  { %v1834_v22 = vrot.slane %v1829_v21, 6  ;;  %v2543_v24 = vpop.f32.mrb[15].mxu1 }
0x25e0   :  { %v1836_v25 = vadd.f32 %v1834_v22, %v3396_v35  ;;  %v2104_v22 = vld [vmem:[%s3595_s9 + $0x8] sm:$0xff] }
0x25e1   :  { %v2686_v24 = vpack.c.bf16 %v2104_v22, %v2103_v27 }
0x25e2   :  { %v2270_v26 = vmul.f32 -1.442695, %v1836_v25 }
0x25e4   :  { %2812 = vpow2.f32 %v2270_v26 }
0x25e5   :  { %2814 = vtanh.f32 %v1836_v25 }
0x25ee   :  { %v2813_v28 = vpop.eup %2812 }
0x25ef   :  { %v1841_v29 = vadd.f32 1.0, %v2813_v28  ;;  %v2815_v30 = vpop.eup %2814 }
0x25f1   :  { %2816 = vrcp.f32 %v1841_v29 }
0x25fb   :  { %v2817_v14 = vpop.eup %2816 }
0x25fc   :  { %v1844_v31 = vsel %vm3237_vm5, %v2815_v30, %v2817_v14 }
0x25fd   :  { %1850 = vrot.lane.b32.xlu1 %v1844_v31, %s3034_s5  ;;  %v1848_v34 = vmul.f32 %v1846_v33, %v1844_v31 }
0x266f   :  { %v1851_v32 = vpop.permute.xlu1 %1850 }
0x2670   :  { %v1853_v23 = vmul.f32 %v1851_v32, %v1844_v31 }
0x2672   :  { %1855 = vrot.lane.b32.xlu0 %v1853_v23, %s3023_s18 }
0x26e4   :  { %v1856_v36 = vpop.permute.xlu0 %1855 }
0x26e5   :  { %v1858_v39 = vadd.f32 %v1856_v36, %v1848_v34 }
0x26e7   :  { %2818 = vtanh.f32 %v1858_v39  ;;  %v1958_v55 = vrot.slane %v1858_v39, 6 }
0x26f1   :  { %v2819_v40 = vpop.eup %2818 }
0x26f2   :  { %1861 = vrot.lane.b32.xlu1 %v2819_v40, %s3034_s5 }
0x2764   :  { %v1862_v18 = vpop.permute.xlu1 %1861 }
0x2765   :  { %v3486_v41 = vmul.f32 %v1862_v18, %v1844_v31 }
0x2767   :  { %v1870_v42 = vrot.slane %v3486_v41, 2 }
0x2769   :  { %1871 = vrot.lane.b32.xlu0 %v1870_v42, %s3023_s18 }
0x27db   :  { %v1872_v43 = vpop.permute.xlu0 %1871 }
0x27dc   :  { %2553 = vmatmul.mubr.msk.f32.vlgmr.msra.gmra.mrb[16].mxu0 %vm215_vm2, %v1872_v43 }
0x27dd   :  { %2574 = vmatprep.mubr.msk.f32.mxu0 %vm3032_vm0, %v3033_v1  ;;  %2687 = vmatpush3.bf16.msra.mxu0 %v2686_v24 }
0x27de   :  { %2688 = vmatprep.subr.bf16.mxu0 %v3031_v0 }
0x28af   :  { %v1941_v45 = vpop.f32.mrb[16].mxu0 }
0x28b0   :  { %v1946_v46 = vrot.slane %v1941_v45, 4  ;;  %v2554_v47 = vpop.f32.mrb[17].mxu0 }
0x28b2   :  { %v1948_v48 = vadd.f32 %v1946_v46, %v3396_v35 }
0x28b4   :  { %v2272_v49 = vmul.f32 -1.442695, %v1948_v48 }
0x28b6   :  { %2820 = vpow2.f32 %v2272_v49 }
0x28b7   :  { %2822 = vtanh.f32 %v1948_v48 }
0x28c0   :  { %v2821_v50 = vpop.eup %2820 }
0x28c1   :  { %v1953_v51 = vadd.f32 1.0, %v2821_v50  ;;  %v2823_v52 = vpop.eup %2822 }
0x28c3   :  { %2824 = vrcp.f32 %v1953_v51 }
0x28cd   :  { %v2825_v53 = vpop.eup %2824 }
0x28ce   :  { %v1956_v54 = vsel %vm3237_vm5, %v2823_v52, %v2825_v53 }
0x28cf   :  { %1962 = vrot.lane.b32.xlu1 %v1956_v54, %s3034_s5  ;;  %v1960_v56 = vmul.f32 %v1958_v55, %v1956_v54 }
0x2941   :  { %v1963_v37 = vpop.permute.xlu1 %1962 }
0x2942   :  { %v1965_v1 = vmul.f32 %v1963_v37, %v1956_v54 }
0x2944   :  { %1967 = vrot.lane.b32.xlu0 %v1965_v1, %s3023_s18 }
0x29b6   :  { %v1968_v57 = vpop.permute.xlu0 %1967 }
0x29b7   :  { %v1970_v59 = vadd.f32 %v1968_v57, %v1960_v56 }
0x29b9   :  { %2826 = vtanh.f32 %v1970_v59  ;;  %v2070_v17 = vrot.slane %v1970_v59, 6 }
0x29c3   :  { %v2827_v61 = vpop.eup %2826 }
0x29c4   :  { %1973 = vrot.lane.b32.xlu1 %v2827_v61, %s3034_s5 }
0x2a36   :  { %v1974_v62 = vpop.permute.xlu1 %1973 }
0x2a37   :  { %v1976_v63 = vmul.f32 %v1974_v62, %v1956_v54 }
0x2a39   :  { %v1982_v16 = vrot.slane %v1976_v63, 4 }
0x2a3b   :  { %1983 = vrot.lane.b32.xlu0 %v1982_v16, %s3023_s18 }
0x2aad   :  { %v1984_v2 = vpop.permute.xlu0 %1983 }
0x2aae   :  { %2564 = vmatmul.mubr.msk.f32.vlgmr.msra.gmra.mrb[16].mxu1 %vm215_vm2, %v1984_v2 }
0x2b81   :  { %v2053_v3 = vpop.f32.mrb[16].mxu1 }
0x2b82   :  { %v2058_v5 = vrot.slane %v2053_v3, 2  ;;  %v2565_v6 = vpop.f32.mrb[17].mxu1 }
0x2b84   :  { %v2060_v60 = vadd.f32 %v2058_v5, %v3396_v35 }
0x2b86   :  { %v2274_v44 = vmul.f32 -1.442695, %v2060_v60 }
0x2b88   :  { %2828 = vpow2.f32 %v2274_v44 }
0x2b89   :  { %2830 = vtanh.f32 %v2060_v60 }
0x2b92   :  { %v2829_v7 = vpop.eup %2828 }
0x2b93   :  { %v2065_v9 = vadd.f32 1.0, %v2829_v7  ;;  %v2831_v10 = vpop.eup %2830 }
0x2b95   :  { %2832 = vrcp.f32 %v2065_v9 }
0x2b9f   :  { %v2833_v13 = vpop.eup %2832 }
0x2ba0   :  { %v2068_v8 = vsel %vm3237_vm5, %v2831_v10, %v2833_v13 }
0x2ba1   :  { %2074 = vrot.lane.b32.xlu1 %v2068_v8, %s3034_s5  ;;  %v2072_v19 = vmul.f32 %v2070_v17, %v2068_v8 }
0x2c13   :  { %v2075_v15 = vpop.permute.xlu1 %2074 }
0x2c14   :  { %v2077_v12 = vmul.f32 %v2075_v15, %v2068_v8 }
0x2c16   :  { %2079 = vrot.lane.b32.xlu0 %v2077_v12, %s3023_s18 }
0x2c88   :  { %v2080_v35 = vpop.permute.xlu0 %2079 }
0x2c89   :  { %v2082_v20 = vadd.f32 %v2080_v35, %v2072_v19 }
0x2c8b   :  { %2834 = vtanh.f32 %v2082_v20 }
0x2c95   :  { %v2835_v21 = vpop.eup %2834 }
0x2c96   :  { %2085 = vrot.lane.b32.xlu1 %v2835_v21, %s3034_s5 }
0x2c9a   :  { %1105 = vrot.lane.b32.xlu1 %v3352_v4, %s3035_s8  ;;  %v2105_v4 = vld [vmem:[%s3595_s9 + $0x10] sm:$0xff] }
0x2c9e   :  { %1424 = vrot.lane.b32.xlu1 %v3421_v11, %s3023_s18  ;;  %v2106_v11 = vld [vmem:[%s3595_s9 + $0x18] sm:$0xff]  ;;  %s3036_s9 = smov [#allocation13]  }
0x2c9f   :  { %s2204_s7 = sshll.u32 %s3036_s9, 4  ;;  %s2205_s7 = int_to_ptr.vmem [resolvable:$true] %s2204_s7 }
0x2ca0   :  { %s2946_s26 = scalar_lea.vmem %s2205_s7, 64  ;;  %p2951_p13 = scmp.lt.s32.totalorder %s2205_s7, %s2205_s7 }
0x2ca1   :  { %p2947_p12 = scmp.ne.s32.totalorder %s2205_s7, %s2946_s26  ;;  %p2952_p0 = scmp.lt.s32.totalorder %s2946_s26, %s2946_s26 }
0x2ca2   :  { %1648 = vrot.lane.b32.xlu1 %v3455_v58, %s3023_s18  ;;  %v2689_v58 = vpack.c.bf16 %v2106_v11, %v2105_v4 }
0x2ca3   :  { %p2953_p1 = por %p2952_p0, %p2951_p13 }
0x2ca4   :  { %2690 = vmatpush3.bf16.msra.mxu0 %v2689_v58 }
0x2ca5   :  { %p2954_p2 = pnand %p2953_p1, %p2947_p12 }
0x2ca6   :  { %1978 = vrot.lane.b32.xlu1 %v1976_v63, %s3023_s18 }
0x2d08   :  { %v2086_v25 = vpop.permute.xlu1 %2085 }
0x2d09   :  { %v2088_v26 = vmul.f32 %v2086_v25, %v2068_v8 }
0x2d0b   :  { %2090 = vrot.lane.b32.xlu0 %v2088_v26, %s3023_s18 }
0x2d0c   :  { %v1106_v28 = vpop.permute.xlu1 %1105 }
0x2d0d   :  { %1108 = vst.msk [vmem:[#allocation15 - $0x6] sm:$0xc0] %vm659_vm8, %v1106_v28 }
0x2d0f   :  { %2097 = vrot.lane.b32.xlu0 %v2082_v20, %s3035_s8 }
0x2d10   :  { %v1425_v29 = vpop.permute.xlu1 %1424 }
0x2d11   :  { %1427 = vst.msk [vmem:[#allocation2] sm:$0xc] %vm433_vm7, %v1425_v29 }
0x2d13   :  { %1536 = vrot.lane.b32.xlu0 %v3438_v38, %s3023_s18 }
0x2d14   :  { %v1649_v0 = vpop.permute.xlu1 %1648 }
0x2d15   :  { %1651 = vst.msk [vmem:[#allocation2] sm:$0xc0] %vm659_vm8, %v1649_v0 }
0x2d17   :  { %1866 = vrot.lane.b32.xlu0 %v3486_v41, %s3023_s18 }
0x2d18   :  { %v1979_v30 = vpop.permute.xlu1 %1978 }
0x2d19   :  { %1981 = vst.msk [vmem:[#allocation2 + $0x8] sm:$0x30] %vm546_vm9, %v1979_v30 }
0x2d7d   :  { %v2091_v14 = vpop.permute.xlu0 %2090 }
0x2d7e   :  { %2093 = vst.msk [vmem:[#allocation2 + $0x8] sm:$0xc0] %vm659_vm8, %v2091_v14  ;;  %2095 = vst.msk [vmem:[#allocation13 - $0x4] sm:$0xc0] %vm659_vm8, %v2091_v14 }
0x2d81   :  { %v2098_v31 = vpop.permute.xlu0 %2097 }
0x2d82   :  { %2101 = vst.msk [vmem:[#allocation15 - $0x4] sm:$0xc0] %vm659_vm8, %v2098_v31 }
0x2d85   :  { %v1537_v32 = vpop.permute.xlu0 %1536  ;;  %v2102_v23 = vld [vmem:[#allocation2 + $0xe] sm:$0x3] }
0x2d86   :  { %1539 = vst.msk [vmem:[#allocation2] sm:$0x30] %vm546_vm9, %v1537_v32  ;;  %2575 = vmatmul.mubr.msk.f32.vlgmr.msra.gmra.mrb[18].mxu0 %vm215_vm2, %v2102_v23 }
0x2d89   :  { %v1867_v38 = vpop.permute.xlu0 %1866 }
0x2d8a   :  { %1869 = vst.msk [vmem:[#allocation2 + $0x8] sm:$0xc] %vm433_vm7, %v1867_v38 }
0x2d8b   :  { %2957 = shalt.err (!%p2954_p2)
}
0x2d8c   :  { %s2958_s14 = scalar_lea.hbm %s3598_s12, 64 }
0x2d8d   :  { %p2959_p3 = scmp.ne.s32.totalorder %s3598_s12, %s2958_s14  ;;  %p2962_p4 = scmp.lt.u32.totalorder %s2958_s14, %s3598_s12 }
0x2d8f   :  { %p2964_p5 = pnand %p2962_p4, %p2959_p3 }
0x2d91   :  { %2967 = shalt.err (!%p2964_p5)
}
0x2d92   :  { %2210 = dma.vmem_to_hbm [thread:$0]  %s2205_s7, 64, %s3598_s12, [#allocation14], %s3023_s18, %s3023_s18, %s3024_s19  }
0x2d93   :  { %s3037_s4 = smov [#allocation15]  }
0x2d94   :  { %s2216_s5 = sshll.u32 %s3037_s4, 4  ;;  %s2217_s5 = int_to_ptr.vmem [resolvable:$true] %s2216_s5 }
0x2d95   :  { %s2968_s16 = scalar_lea.vmem %s2217_s5, 64  ;;  %p2973_p7 = scmp.lt.s32.totalorder %s2217_s5, %s2217_s5 }
0x2d96   :  { %p2969_p6 = scmp.ne.s32.totalorder %s2217_s5, %s2968_s16  ;;  %p2974_p8 = scmp.lt.s32.totalorder %s2968_s16, %s2968_s16 }
0x2d98   :  { %p2975_p9 = por %p2974_p8, %p2973_p7 }
0x2d9a   :  { %p2976_p10 = pnand %p2975_p9, %p2969_p6 }
0x2d9c   :  { %2979 = shalt.err (!%p2976_p10)
}
0x2d9d   :  { %s2980_s22 = scalar_lea.hbm %s3599_s13, 64 }
0x2d9e   :  { %p2981_p11 = scmp.ne.s32.totalorder %s3599_s13, %s2980_s22  ;;  %p2984_p12 = scmp.lt.u32.totalorder %s2980_s22, %s3599_s13 }
0x2da0   :  { %p2986_p13 = pnand %p2984_p12, %p2981_p11 }
0x2da2   :  { %2989 = shalt.err (!%p2986_p13)
}
0x2da3   :  { %2222 = dma.vmem_to_hbm [thread:$0]  %s2217_s5, 64, %s3599_s13, [#allocation14], %s3023_s18, %s3023_s18, %s3024_s19   ;;  %vm2187_vm10 = vcmask 25600  }
0x2da4   :  { %v2275_v33 = vld [vmem:[%s3596_s10] ss:$0 sm:$0xff]  ;;  %s3038_s9 = smov [#allocation12]  }
0x2da5   :  { %s2195_s7 = sshll.u32 %s3038_s9, 4  ;;  %s2196_s7 = int_to_ptr.vmem [resolvable:$true] %s2195_s7 }
0x2da6   :  { %s2990_s26 = scalar_lea.vmem %s2196_s7, 32  ;;  %p2995_p1 = scmp.lt.s32.totalorder %s2196_s7, %s2196_s7 }
0x2da7   :  { %p2991_p0 = scmp.ne.s32.totalorder %s2196_s7, %s2990_s26  ;;  %p2996_p2 = scmp.lt.s32.totalorder %s2990_s26, %s2990_s26 }
0x2da9   :  { %p2997_p3 = por %p2996_p2, %p2995_p1 }
0x2dab   :  { %p2998_p4 = pnand %p2997_p3, %p2991_p0 }
0x2e59   :  { %v2183_v34 = vpop.f32.mrb[18].mxu0 }
0x2e5a   :  { %v2184_v36 = vadd.f32 %v2275_v33, %v2183_v34  ;;  %v2576_v39 = vpop.f32.mrb[19].mxu0 }
0x2e5c   :  { %2188 = vst.msk [vmem:[#allocation12] sm:$0x3] %vm2187_vm10, %v2184_v36 }
0x2e5d   :  { %3001 = shalt.err (!%p2998_p4)
}
0x2e5e   :  { %s3002_s19 = scalar_lea.hbm %s3597_s11, 32 }
0x2e5f   :  { %p3003_p5 = scmp.ne.s32.totalorder %s3597_s11, %s3002_s19  ;;  %p3006_p6 = scmp.lt.u32.totalorder %s3002_s19, %s3597_s11 }
0x2e61   :  { %p3008_p7 = pnand %p3006_p6, %p3003_p5 }
0x2e63   :  { %3011 = shalt.err (!%p3008_p7)
}
0x2e64   :  { %2198 = dma.vmem_to_hbm [thread:$0]  %s2196_s7, 32, %s3597_s11, [#allocation5]  }
0x2e65   :  { %3018 = dma.done.wait [#allocation5], 32  }
0x2e66   :  { %3019 = vsyncadd [#allocation5], 4294967264 }
0x2e67   :  { %3020 = dma.done.wait [#allocation14], 128  }
0x2e68   :  { %3021 = vsyncadd [#allocation14], 4294967168 }
0x2e69   :  { %2232 = vsyncpa [#allocation4], 1 }
0x2e6a   :  { %2233 = vsyncpa [#allocation7], 1 }
0x2e6b   :  { %2234 = vsyncpa [#allocation10], 1 }
0x2e6c   :  { %2235 = vsyncpa [#allocation5], 1 }
0x2e6d   :  { %2236 = vsyncpa [#allocation14], 1 }

</bundles_post_ra>
